<compile_context>
chip_gen: v5e
topology: v5e:2x2
jax: 0.10.0
libtpu: 0.0.40
codegen_flags: <defaults>
</compile_context>

<pallas_src>
import math

import jax
import jax.numpy as jnp
from jax.experimental import pallas as pl
from jax.experimental.pallas import tpu as pltpu

# --- synthetic small HF-style text encoder hyperparameters ---
VOCAB = 256
PAD_ID = 0
B, S = 2, 8
BS = B * S
D = 32            # d_model (transformer width)
H = 4             # attention heads
DH = D // H       # head dim
F = 64            # FFN intermediate size
L = 2             # number of transformer layers
OUT_DIM = 16      # HFTextEncoder output_dim (proj = 'linear')
LN_EPS = 1e-5
NEG_INF = -1e9    # stands in for torch.finfo(dtype).min additive mask

# rows of the packed (L, 6, D) per-layer vector operand
_BO, _LN1G, _LN1B, _B2, _LN2G, _LN2B = range(6)


def _layer_norm(x, g, b):
    # single-pass variance: E[x^2] - mu^2 (halves the cross-lane reduction work)
    mu = jnp.mean(x, axis=-1, keepdims=True)
    ex2 = jnp.mean(x * x, axis=-1, keepdims=True)
    var = ex2 - mu * mu
    return (x - mu) * jax.lax.rsqrt(var + LN_EPS) * g + b


def encoder_kernel(emb_ref, mask_ref, wqkv_ref, bqkv_ref, wo_ref,
                   w1_ref, b1_ref, w2_ref, dvec_ref, wproj_ref,
                   out_ref, ctx_ref):
    h = emb_ref[...]          # (B*S, D) merged-batch hidden states
    mask = mask_ref[...]      # (B*S, B*S) block-diagonal + key-padding additive mask
    scale = 1.0 / math.sqrt(DH)

    for l in range(L):        # static unroll over layers (all weights resident)
        dv = dvec_ref[l]      # (6, D) packed per-layer vectors
        bo = dv[_BO:_BO + 1, :]
        ln1g = dv[_LN1G:_LN1G + 1, :]
        ln1b = dv[_LN1B:_LN1B + 1, :]
        b2 = dv[_B2:_B2 + 1, :]
        ln2g = dv[_LN2G:_LN2G + 1, :]
        ln2b = dv[_LN2B:_LN2B + 1, :]

        # --- fused QKV projection: one (B*S, D) x (D, 3D) matmul ---
        qkv = jnp.dot(h, wqkv_ref[l], preferred_element_type=jnp.float32) + bqkv_ref[l]
        q, k, v = qkv[:, 0:D], qkv[:, D:2 * D], qkv[:, 2 * D:3 * D]

        # --- multi-head self-attention; per-head ctx written at static lane
        # offsets into VMEM scratch (no concatenate) ---
        for hd in range(H):
            sl = slice(hd * DH, (hd + 1) * DH)
            qh, kh, vh = q[:, sl], k[:, sl], v[:, sl]
            s = jax.lax.dot_general(
                qh, kh, (((1,), (1,)), ((), ())),
                preferred_element_type=jnp.float32) * scale
            s = s + mask                                    # (BS, BS)
            s = s - jnp.max(s, axis=-1, keepdims=True)      # stable softmax
            p = jnp.exp(s)
            denom = jnp.sum(p, axis=-1, keepdims=True)
            a = p * pl.reciprocal(denom, approx=True)       # EUP, not VALU divide
            ctx_ref[:, sl] = jnp.dot(a, vh, preferred_element_type=jnp.float32)

        attn_out = jnp.dot(ctx_ref[...], wo_ref[l],
                           preferred_element_type=jnp.float32) + bo
        h = _layer_norm(h + attn_out, ln1g, ln1b)

        # --- feed-forward ---
        # TODO(synk): PyTorch nn.GELU default is exact erf; tanh approximation used here.
        ff = jax.nn.gelu(
            jnp.dot(h, w1_ref[l], preferred_element_type=jnp.float32) + b1_ref[l],
            approximate=True)
        ff = jnp.dot(ff, w2_ref[l], preferred_element_type=jnp.float32) + b2
        h = _layer_norm(h + ff, ln2g, ln2b)

    # --- ClsPooler (cls_token_position = 0) + bias-free linear projection ---
    # Select each batch's CLS row (row b*S of the slab) with a one-hot matmul
    # (MXU) instead of strided sublane gathers, then one lane-dense store.
    row = jax.lax.broadcasted_iota(jnp.int32, (B, BS), 0)
    col = jax.lax.broadcasted_iota(jnp.int32, (B, BS), 1)
    sel = (col == row * S).astype(jnp.float32)               # (B, B*S)
    cls = jnp.dot(sel, h, preferred_element_type=jnp.float32)        # (B, D)
    out_ref[...] = jnp.dot(cls, wproj_ref[...],
                           preferred_element_type=jnp.float32)       # (B, OUT_DIM)


def hf_text_encoder_forward(x_tokens, params):
    # glue: embedding gather + combined (block-diagonal batch + key-padding) mask
    emb = (jnp.take(params["tok_emb"], x_tokens, axis=0)
           + params["pos_emb"][None, :, :]).reshape(BS, D)
    keep = (x_tokens != PAD_ID).reshape(BS)                 # like (x != pad_token_id)
    bid = jnp.repeat(jnp.arange(B), S)
    allowed = (bid[:, None] == bid[None, :]) & keep[None, :]
    mask = jnp.where(allowed, 0.0, NEG_INF).astype(jnp.float32)   # (BS, BS)

    weight_names = ["wqkv", "bqkv", "wo", "w1", "b1", "w2", "dvec", "wproj"]
    w_list = [params[n] for n in weight_names]

    vmem = pl.BlockSpec(memory_space=pltpu.MemorySpace.VMEM)
    out = pl.pallas_call(
        encoder_kernel,
        out_shape=jax.ShapeDtypeStruct((B, OUT_DIM), jnp.float32),
        in_specs=[vmem] * (2 + len(w_list)),
        out_specs=vmem,
        scratch_shapes=[pltpu.VMEM((BS, D), jnp.float32)],
    )(emb, mask, *w_list)
    return out


def init_params(key):
    keys = iter(jax.random.split(key, 8))

    def nrm(shape, scale=0.05):
        return jax.random.normal(next(keys), shape, jnp.float32) * scale

    dvec = jnp.zeros((L, 6, D), jnp.float32)
    dvec = dvec.at[:, _LN1G, :].set(1.0).at[:, _LN2G, :].set(1.0)   # LN gains = 1

    return dict(
        tok_emb=nrm((VOCAB, D), 0.02),
        pos_emb=nrm((S, D), 0.02),
        wqkv=nrm((L, D, 3 * D)),
        bqkv=jnp.zeros((L, 1, 3 * D), jnp.float32),
        wo=nrm((L, D, D)),
        w1=nrm((L, D, F)),
        b1=jnp.zeros((L, 1, F), jnp.float32),
        w2=nrm((L, F, D)),
        dvec=dvec,          # packed [bo, ln1g, ln1b, b2, ln2g, ln2b]
        wproj=nrm((D, OUT_DIM)),
    )


if __name__ == "__main__":
    key = jax.random.PRNGKey(0)
    pkey, tkey = jax.random.split(key)
    params = init_params(pkey)

    x = jax.random.randint(tkey, (B, S), 1, VOCAB, dtype=jnp.int32)
    x = x.at[1, -2:].set(PAD_ID)   # pad the tail of the second sequence

    out = hf_text_encoder_forward(x, params)
    jax.block_until_ready(out)
    assert out.shape == (B, OUT_DIM) and out.dtype == jnp.float32
    print("KERNEL_OK")
</pallas_src>

<mosaic_0001>
module attributes {stable_mosaic.version = 11 : i64} {
  func.func @encoder_kernel(%arg0: memref<16x32xf32, #tpu.memory_space<vmem>>, %arg1: memref<16x16xf32, #tpu.memory_space<vmem>>, %arg2: memref<2x32x96xf32, #tpu.memory_space<vmem>>, %arg3: memref<2x1x96xf32, #tpu.memory_space<vmem>>, %arg4: memref<2x32x32xf32, #tpu.memory_space<vmem>>, %arg5: memref<2x32x64xf32, #tpu.memory_space<vmem>>, %arg6: memref<2x1x64xf32, #tpu.memory_space<vmem>>, %arg7: memref<2x64x32xf32, #tpu.memory_space<vmem>>, %arg8: memref<2x6x32xf32, #tpu.memory_space<vmem>>, %arg9: memref<32x16xf32, #tpu.memory_space<vmem>>, %arg10: memref<2x16xf32, #tpu.memory_space<vmem>>, %arg11: memref<16x32xf32, #tpu.memory_space<vmem>>) attributes {dimension_semantics = [], scalar_prefetch = 0 : i64, scratch_operands = 1 : i64, tpu.core_type = #tpu.core_type<tc>} {
    %c0 = arith.constant 0 : index
    %c0_0 = arith.constant 0 : index
    %0 = vector.load %arg0[%c0, %c0_0] : memref<16x32xf32, #tpu.memory_space<vmem>>, vector<16x32xf32>
    %c0_1 = arith.constant 0 : index
    %c0_2 = arith.constant 0 : index
    %1 = vector.load %arg1[%c0_1, %c0_2] : memref<16x16xf32, #tpu.memory_space<vmem>>, vector<16x16xf32>
    %c0_3 = arith.constant 0 : index
    %c0_4 = arith.constant 0 : index
    %c0_5 = arith.constant 0 : index
    %2 = vector.load %arg8[%c0_3, %c0_4, %c0_5] : memref<2x6x32xf32, #tpu.memory_space<vmem>>, vector<1x6x32xf32>
    %3 = vector.shape_cast %2 : vector<1x6x32xf32> to vector<6x32xf32>
    %4 = vector.extract_strided_slice %3 {offsets = [0, 0], sizes = [1, 32], strides = [1, 1]} : vector<6x32xf32> to vector<1x32xf32>
    %5 = vector.extract_strided_slice %3 {offsets = [1, 0], sizes = [1, 32], strides = [1, 1]} : vector<6x32xf32> to vector<1x32xf32>
    %6 = vector.extract_strided_slice %3 {offsets = [2, 0], sizes = [1, 32], strides = [1, 1]} : vector<6x32xf32> to vector<1x32xf32>
    %7 = vector.extract_strided_slice %3 {offsets = [3, 0], sizes = [1, 32], strides = [1, 1]} : vector<6x32xf32> to vector<1x32xf32>
    %8 = vector.extract_strided_slice %3 {offsets = [4, 0], sizes = [1, 32], strides = [1, 1]} : vector<6x32xf32> to vector<1x32xf32>
    %9 = vector.extract_strided_slice %3 {offsets = [5, 0], sizes = [1, 32], strides = [1, 1]} : vector<6x32xf32> to vector<1x32xf32>
    %c0_6 = arith.constant 0 : index
    %c0_7 = arith.constant 0 : index
    %c0_8 = arith.constant 0 : index
    %10 = vector.load %arg2[%c0_6, %c0_7, %c0_8] : memref<2x32x96xf32, #tpu.memory_space<vmem>>, vector<1x32x96xf32>
    %11 = vector.shape_cast %10 : vector<1x32x96xf32> to vector<32x96xf32>
    %cst = arith.constant dense<0.000000e+00> : vector<16x96xf32>
    %12 = tpu.matmul %0, %11, %cst {dimension_numbers = #tpu.dot_dimension_numbers<[1], [0], [0], [1], [0, 0, 1, 1], [], []>} : vector<16x32xf32>, vector<32x96xf32>, vector<16x96xf32> -> vector<16x96xf32>
    %c0_9 = arith.constant 0 : index
    %c0_10 = arith.constant 0 : index
    %c0_11 = arith.constant 0 : index
    %13 = vector.load %arg3[%c0_9, %c0_10, %c0_11] : memref<2x1x96xf32, #tpu.memory_space<vmem>>, vector<1x1x96xf32>
    %14 = vector.shape_cast %13 : vector<1x1x96xf32> to vector<1x96xf32>
    %15 = vector.broadcast %14 : vector<1x96xf32> to vector<16x96xf32>
    %16 = arith.addf %12, %15 : vector<16x96xf32>
    %17 = vector.extract_strided_slice %16 {offsets = [0, 0], sizes = [16, 32], strides = [1, 1]} : vector<16x96xf32> to vector<16x32xf32>
    %18 = vector.extract_strided_slice %16 {offsets = [0, 32], sizes = [16, 32], strides = [1, 1]} : vector<16x96xf32> to vector<16x32xf32>
    %19 = vector.extract_strided_slice %16 {offsets = [0, 64], sizes = [16, 32], strides = [1, 1]} : vector<16x96xf32> to vector<16x32xf32>
    %20 = vector.extract_strided_slice %17 {offsets = [0, 0], sizes = [16, 8], strides = [1, 1]} : vector<16x32xf32> to vector<16x8xf32>
    %21 = vector.extract_strided_slice %18 {offsets = [0, 0], sizes = [16, 8], strides = [1, 1]} : vector<16x32xf32> to vector<16x8xf32>
    %22 = vector.extract_strided_slice %19 {offsets = [0, 0], sizes = [16, 8], strides = [1, 1]} : vector<16x32xf32> to vector<16x8xf32>
    %cst_12 = arith.constant dense<0.000000e+00> : vector<16x16xf32>
    %23 = tpu.matmul %20, %21, %cst_12 {dimension_numbers = #tpu.dot_dimension_numbers<[1], [1], [0], [0], [0, 0, 1, 0], [], []>} : vector<16x8xf32>, vector<16x8xf32>, vector<16x16xf32> -> vector<16x16xf32>
    %cst_13 = arith.constant 0.353553385 : f32
    %24 = vector.broadcast %cst_13 : f32 to vector<16x16xf32>
    %25 = arith.mulf %23, %24 : vector<16x16xf32>
    %26 = arith.addf %25, %1 : vector<16x16xf32>
    %cst_14 = arith.constant dense<0xFF800000> : vector<16xf32>
    %27 = vector.multi_reduction <maximumf>, %26, %cst_14 [1] : vector<16x16xf32> to vector<16xf32>
    %28 = vector.shape_cast %27 : vector<16xf32> to vector<16x1xf32>
    %29 = vector.broadcast %28 : vector<16x1xf32> to vector<16x16xf32>
    %30 = arith.subf %26, %29 : vector<16x16xf32>
    %31 = math.exp %30 : vector<16x16xf32>
    %cst_15 = arith.constant dense<0.000000e+00> : vector<16xf32>
    %32 = vector.multi_reduction <add>, %31, %cst_15 [1] : vector<16x16xf32> to vector<16xf32>
    %33 = vector.shape_cast %32 : vector<16xf32> to vector<16x1xf32>
    %34 = tpu.reciprocal %33 {approx = true} : vector<16x1xf32> -> vector<16x1xf32>
    %35 = vector.broadcast %34 : vector<16x1xf32> to vector<16x16xf32>
    %36 = arith.mulf %31, %35 : vector<16x16xf32>
    %cst_16 = arith.constant dense<0.000000e+00> : vector<16x8xf32>
    %37 = tpu.matmul %36, %22, %cst_16 {dimension_numbers = #tpu.dot_dimension_numbers<[1], [0], [0], [1], [0, 0, 1, 1], [], []>} : vector<16x16xf32>, vector<16x8xf32>, vector<16x8xf32> -> vector<16x8xf32>
    %c0_17 = arith.constant 0 : index
    %c0_18 = arith.constant 0 : index
    %38 = vector.load %arg11[%c0_17, %c0_18] : memref<16x32xf32, #tpu.memory_space<vmem>>, vector<16x8xf32>
    tpu.vector_store %arg11[%c0_17, %c0_18], %37 {strides = array<i32>} : memref<16x32xf32, #tpu.memory_space<vmem>>, vector<16x8xf32>,
    %39 = vector.extract_strided_slice %17 {offsets = [0, 8], sizes = [16, 8], strides = [1, 1]} : vector<16x32xf32> to vector<16x8xf32>
    %40 = vector.extract_strided_slice %18 {offsets = [0, 8], sizes = [16, 8], strides = [1, 1]} : vector<16x32xf32> to vector<16x8xf32>
    %41 = vector.extract_strided_slice %19 {offsets = [0, 8], sizes = [16, 8], strides = [1, 1]} : vector<16x32xf32> to vector<16x8xf32>
    %cst_19 = arith.constant dense<0.000000e+00> : vector<16x16xf32>
    %42 = tpu.matmul %39, %40, %cst_19 {dimension_numbers = #tpu.dot_dimension_numbers<[1], [1], [0], [0], [0, 0, 1, 0], [], []>} : vector<16x8xf32>, vector<16x8xf32>, vector<16x16xf32> -> vector<16x16xf32>
    %cst_20 = arith.constant 0.353553385 : f32
    %43 = vector.broadcast %cst_20 : f32 to vector<16x16xf32>
    %44 = arith.mulf %42, %43 : vector<16x16xf32>
    %45 = arith.addf %44, %1 : vector<16x16xf32>
    %cst_21 = arith.constant dense<0xFF800000> : vector<16xf32>
    %46 = vector.multi_reduction <maximumf>, %45, %cst_21 [1] : vector<16x16xf32> to vector<16xf32>
    %47 = vector.shape_cast %46 : vector<16xf32> to vector<16x1xf32>
    %48 = vector.broadcast %47 : vector<16x1xf32> to vector<16x16xf32>
    %49 = arith.subf %45, %48 : vector<16x16xf32>
    %50 = math.exp %49 : vector<16x16xf32>
    %cst_22 = arith.constant dense<0.000000e+00> : vector<16xf32>
    %51 = vector.multi_reduction <add>, %50, %cst_22 [1] : vector<16x16xf32> to vector<16xf32>
    %52 = vector.shape_cast %51 : vector<16xf32> to vector<16x1xf32>
    %53 = tpu.reciprocal %52 {approx = true} : vector<16x1xf32> -> vector<16x1xf32>
    %54 = vector.broadcast %53 : vector<16x1xf32> to vector<16x16xf32>
    %55 = arith.mulf %50, %54 : vector<16x16xf32>
    %cst_23 = arith.constant dense<0.000000e+00> : vector<16x8xf32>
    %56 = tpu.matmul %55, %41, %cst_23 {dimension_numbers = #tpu.dot_dimension_numbers<[1], [0], [0], [1], [0, 0, 1, 1], [], []>} : vector<16x16xf32>, vector<16x8xf32>, vector<16x8xf32> -> vector<16x8xf32>
    %c0_24 = arith.constant 0 : index
    %c8 = arith.constant 8 : index
    %57 = vector.load %arg11[%c0_24, %c8] : memref<16x32xf32, #tpu.memory_space<vmem>>, vector<16x8xf32>
    tpu.vector_store %arg11[%c0_24, %c8], %56 {strides = array<i32>} : memref<16x32xf32, #tpu.memory_space<vmem>>, vector<16x8xf32>,
    %58 = vector.extract_strided_slice %17 {offsets = [0, 16], sizes = [16, 8], strides = [1, 1]} : vector<16x32xf32> to vector<16x8xf32>
    %59 = vector.extract_strided_slice %18 {offsets = [0, 16], sizes = [16, 8], strides = [1, 1]} : vector<16x32xf32> to vector<16x8xf32>
    %60 = vector.extract_strided_slice %19 {offsets = [0, 16], sizes = [16, 8], strides = [1, 1]} : vector<16x32xf32> to vector<16x8xf32>
    %cst_25 = arith.constant dense<0.000000e+00> : vector<16x16xf32>
    %61 = tpu.matmul %58, %59, %cst_25 {dimension_numbers = #tpu.dot_dimension_numbers<[1], [1], [0], [0], [0, 0, 1, 0], [], []>} : vector<16x8xf32>, vector<16x8xf32>, vector<16x16xf32> -> vector<16x16xf32>
    %cst_26 = arith.constant 0.353553385 : f32
    %62 = vector.broadcast %cst_26 : f32 to vector<16x16xf32>
    %63 = arith.mulf %61, %62 : vector<16x16xf32>
    %64 = arith.addf %63, %1 : vector<16x16xf32>
    %cst_27 = arith.constant dense<0xFF800000> : vector<16xf32>
    %65 = vector.multi_reduction <maximumf>, %64, %cst_27 [1] : vector<16x16xf32> to vector<16xf32>
    %66 = vector.shape_cast %65 : vector<16xf32> to vector<16x1xf32>
    %67 = vector.broadcast %66 : vector<16x1xf32> to vector<16x16xf32>
    %68 = arith.subf %64, %67 : vector<16x16xf32>
    %69 = math.exp %68 : vector<16x16xf32>
    %cst_28 = arith.constant dense<0.000000e+00> : vector<16xf32>
    %70 = vector.multi_reduction <add>, %69, %cst_28 [1] : vector<16x16xf32> to vector<16xf32>
    %71 = vector.shape_cast %70 : vector<16xf32> to vector<16x1xf32>
    %72 = tpu.reciprocal %71 {approx = true} : vector<16x1xf32> -> vector<16x1xf32>
    %73 = vector.broadcast %72 : vector<16x1xf32> to vector<16x16xf32>
    %74 = arith.mulf %69, %73 : vector<16x16xf32>
    %cst_29 = arith.constant dense<0.000000e+00> : vector<16x8xf32>
    %75 = tpu.matmul %74, %60, %cst_29 {dimension_numbers = #tpu.dot_dimension_numbers<[1], [0], [0], [1], [0, 0, 1, 1], [], []>} : vector<16x16xf32>, vector<16x8xf32>, vector<16x8xf32> -> vector<16x8xf32>
    %c0_30 = arith.constant 0 : index
    %c16 = arith.constant 16 : index
    %76 = vector.load %arg11[%c0_30, %c16] : memref<16x32xf32, #tpu.memory_space<vmem>>, vector<16x8xf32>
    tpu.vector_store %arg11[%c0_30, %c16], %75 {strides = array<i32>} : memref<16x32xf32, #tpu.memory_space<vmem>>, vector<16x8xf32>,
    %77 = vector.extract_strided_slice %17 {offsets = [0, 24], sizes = [16, 8], strides = [1, 1]} : vector<16x32xf32> to vector<16x8xf32>
    %78 = vector.extract_strided_slice %18 {offsets = [0, 24], sizes = [16, 8], strides = [1, 1]} : vector<16x32xf32> to vector<16x8xf32>
    %79 = vector.extract_strided_slice %19 {offsets = [0, 24], sizes = [16, 8], strides = [1, 1]} : vector<16x32xf32> to vector<16x8xf32>
    %cst_31 = arith.constant dense<0.000000e+00> : vector<16x16xf32>
    %80 = tpu.matmul %77, %78, %cst_31 {dimension_numbers = #tpu.dot_dimension_numbers<[1], [1], [0], [0], [0, 0, 1, 0], [], []>} : vector<16x8xf32>, vector<16x8xf32>, vector<16x16xf32> -> vector<16x16xf32>
    %cst_32 = arith.constant 0.353553385 : f32
    %81 = vector.broadcast %cst_32 : f32 to vector<16x16xf32>
    %82 = arith.mulf %80, %81 : vector<16x16xf32>
    %83 = arith.addf %82, %1 : vector<16x16xf32>
    %cst_33 = arith.constant dense<0xFF800000> : vector<16xf32>
    %84 = vector.multi_reduction <maximumf>, %83, %cst_33 [1] : vector<16x16xf32> to vector<16xf32>
    %85 = vector.shape_cast %84 : vector<16xf32> to vector<16x1xf32>
    %86 = vector.broadcast %85 : vector<16x1xf32> to vector<16x16xf32>
    %87 = arith.subf %83, %86 : vector<16x16xf32>
    %88 = math.exp %87 : vector<16x16xf32>
    %cst_34 = arith.constant dense<0.000000e+00> : vector<16xf32>
    %89 = vector.multi_reduction <add>, %88, %cst_34 [1] : vector<16x16xf32> to vector<16xf32>
    %90 = vector.shape_cast %89 : vector<16xf32> to vector<16x1xf32>
    %91 = tpu.reciprocal %90 {approx = true} : vector<16x1xf32> -> vector<16x1xf32>
    %92 = vector.broadcast %91 : vector<16x1xf32> to vector<16x16xf32>
    %93 = arith.mulf %88, %92 : vector<16x16xf32>
    %cst_35 = arith.constant dense<0.000000e+00> : vector<16x8xf32>
    %94 = tpu.matmul %93, %79, %cst_35 {dimension_numbers = #tpu.dot_dimension_numbers<[1], [0], [0], [1], [0, 0, 1, 1], [], []>} : vector<16x16xf32>, vector<16x8xf32>, vector<16x8xf32> -> vector<16x8xf32>
    %c0_36 = arith.constant 0 : index
    %c24 = arith.constant 24 : index
    %95 = vector.load %arg11[%c0_36, %c24] : memref<16x32xf32, #tpu.memory_space<vmem>>, vector<16x8xf32>
    tpu.vector_store %arg11[%c0_36, %c24], %94 {strides = array<i32>} : memref<16x32xf32, #tpu.memory_space<vmem>>, vector<16x8xf32>,
    %c0_37 = arith.constant 0 : index
    %c0_38 = arith.constant 0 : index
    %96 = vector.load %arg11[%c0_37, %c0_38] : memref<16x32xf32, #tpu.memory_space<vmem>>, vector<16x32xf32>
    %c0_39 = arith.constant 0 : index
    %c0_40 = arith.constant 0 : index
    %c0_41 = arith.constant 0 : index
    %97 = vector.load %arg4[%c0_39, %c0_40, %c0_41] : memref<2x32x32xf32, #tpu.memory_space<vmem>>, vector<1x32x32xf32>
    %98 = vector.shape_cast %97 : vector<1x32x32xf32> to vector<32x32xf32>
    %cst_42 = arith.constant dense<0.000000e+00> : vector<16x32xf32>
    %99 = tpu.matmul %96, %98, %cst_42 {dimension_numbers = #tpu.dot_dimension_numbers<[1], [0], [0], [1], [0, 0, 1, 1], [], []>} : vector<16x32xf32>, vector<32x32xf32>, vector<16x32xf32> -> vector<16x32xf32>
    %100 = vector.broadcast %4 : vector<1x32xf32> to vector<16x32xf32>
    %101 = arith.addf %99, %100 : vector<16x32xf32>
    %102 = arith.addf %0, %101 : vector<16x32xf32>
    %cst_43 = arith.constant dense<0.000000e+00> : vector<16xf32>
    %103 = vector.multi_reduction <add>, %102, %cst_43 [1] : vector<16x32xf32> to vector<16xf32>
    %104 = vector.shape_cast %103 : vector<16xf32> to vector<16x1xf32>
    %cst_44 = arith.constant 3.200000e+01 : f32
    %105 = vector.broadcast %cst_44 : f32 to vector<16x1xf32>
    %106 = arith.divf %104, %105 : vector<16x1xf32>
    %107 = arith.mulf %102, %102 : vector<16x32xf32>
    %cst_45 = arith.constant dense<0.000000e+00> : vector<16xf32>
    %108 = vector.multi_reduction <add>, %107, %cst_45 [1] : vector<16x32xf32> to vector<16xf32>
    %109 = vector.shape_cast %108 : vector<16xf32> to vector<16x1xf32>
    %cst_46 = arith.constant 3.200000e+01 : f32
    %110 = vector.broadcast %cst_46 : f32 to vector<16x1xf32>
    %111 = arith.divf %109, %110 : vector<16x1xf32>
    %112 = arith.mulf %106, %106 : vector<16x1xf32>
    %113 = arith.subf %111, %112 : vector<16x1xf32>
    %114 = vector.broadcast %106 : vector<16x1xf32> to vector<16x32xf32>
    %115 = arith.subf %102, %114 : vector<16x32xf32>
    %cst_47 = arith.constant 9.99999974E-6 : f32
    %116 = vector.broadcast %cst_47 : f32 to vector<16x1xf32>
    %117 = arith.addf %113, %116 : vector<16x1xf32>
    %118 = math.rsqrt %117 : vector<16x1xf32>
    %119 = vector.broadcast %118 : vector<16x1xf32> to vector<16x32xf32>
    %120 = arith.mulf %115, %119 : vector<16x32xf32>
    %121 = vector.broadcast %5 : vector<1x32xf32> to vector<16x32xf32>
    %122 = arith.mulf %120, %121 : vector<16x32xf32>
    %123 = vector.broadcast %6 : vector<1x32xf32> to vector<16x32xf32>
    %124 = arith.addf %122, %123 : vector<16x32xf32>
    %c0_48 = arith.constant 0 : index
    %c0_49 = arith.constant 0 : index
    %c0_50 = arith.constant 0 : index
    %125 = vector.load %arg5[%c0_48, %c0_49, %c0_50] : memref<2x32x64xf32, #tpu.memory_space<vmem>>, vector<1x32x64xf32>
    %126 = vector.shape_cast %125 : vector<1x32x64xf32> to vector<32x64xf32>
    %cst_51 = arith.constant dense<0.000000e+00> : vector<16x64xf32>
    %127 = tpu.matmul %124, %126, %cst_51 {dimension_numbers = #tpu.dot_dimension_numbers<[1], [0], [0], [1], [0, 0, 1, 1], [], []>} : vector<16x32xf32>, vector<32x64xf32>, vector<16x64xf32> -> vector<16x64xf32>
    %c0_52 = arith.constant 0 : index
    %c0_53 = arith.constant 0 : index
    %c0_54 = arith.constant 0 : index
    %128 = vector.load %arg6[%c0_52, %c0_53, %c0_54] : memref<2x1x64xf32, #tpu.memory_space<vmem>>, vector<1x1x64xf32>
    %129 = vector.shape_cast %128 : vector<1x1x64xf32> to vector<1x64xf32>
    %130 = vector.broadcast %129 : vector<1x64xf32> to vector<16x64xf32>
    %131 = arith.addf %127, %130 : vector<16x64xf32>
    %132 = arith.mulf %131, %131 : vector<16x64xf32>
    %133 = arith.mulf %131, %132 : vector<16x64xf32>
    %cst_55 = arith.constant 4.471500e-02 : f32
    %134 = vector.broadcast %cst_55 : f32 to vector<16x64xf32>
    %135 = arith.mulf %134, %133 : vector<16x64xf32>
    %136 = arith.addf %131, %135 : vector<16x64xf32>
    %cst_56 = arith.constant 0.797884583 : f32
    %137 = vector.broadcast %cst_56 : f32 to vector<16x64xf32>
    %138 = arith.mulf %137, %136 : vector<16x64xf32>
    %139 = math.tanh %138 : vector<16x64xf32>
    %cst_57 = arith.constant 1.000000e+00 : f32
    %140 = vector.broadcast %cst_57 : f32 to vector<16x64xf32>
    %141 = arith.addf %140, %139 : vector<16x64xf32>
    %cst_58 = arith.constant 5.000000e-01 : f32
    %142 = vector.broadcast %cst_58 : f32 to vector<16x64xf32>
    %143 = arith.mulf %142, %141 : vector<16x64xf32>
    %144 = arith.mulf %131, %143 : vector<16x64xf32>
    %c0_59 = arith.constant 0 : index
    %c0_60 = arith.constant 0 : index
    %c0_61 = arith.constant 0 : index
    %145 = vector.load %arg7[%c0_59, %c0_60, %c0_61] : memref<2x64x32xf32, #tpu.memory_space<vmem>>, vector<1x64x32xf32>
    %146 = vector.shape_cast %145 : vector<1x64x32xf32> to vector<64x32xf32>
    %cst_62 = arith.constant dense<0.000000e+00> : vector<16x32xf32>
    %147 = tpu.matmul %144, %146, %cst_62 {dimension_numbers = #tpu.dot_dimension_numbers<[1], [0], [0], [1], [0, 0, 1, 1], [], []>} : vector<16x64xf32>, vector<64x32xf32>, vector<16x32xf32> -> vector<16x32xf32>
    %148 = vector.broadcast %7 : vector<1x32xf32> to vector<16x32xf32>
    %149 = arith.addf %147, %148 : vector<16x32xf32>
    %150 = arith.addf %124, %149 : vector<16x32xf32>
    %cst_63 = arith.constant dense<0.000000e+00> : vector<16xf32>
    %151 = vector.multi_reduction <add>, %150, %cst_63 [1] : vector<16x32xf32> to vector<16xf32>
    %152 = vector.shape_cast %151 : vector<16xf32> to vector<16x1xf32>
    %cst_64 = arith.constant 3.200000e+01 : f32
    %153 = vector.broadcast %cst_64 : f32 to vector<16x1xf32>
    %154 = arith.divf %152, %153 : vector<16x1xf32>
    %155 = arith.mulf %150, %150 : vector<16x32xf32>
    %cst_65 = arith.constant dense<0.000000e+00> : vector<16xf32>
    %156 = vector.multi_reduction <add>, %155, %cst_65 [1] : vector<16x32xf32> to vector<16xf32>
    %157 = vector.shape_cast %156 : vector<16xf32> to vector<16x1xf32>
    %cst_66 = arith.constant 3.200000e+01 : f32
    %158 = vector.broadcast %cst_66 : f32 to vector<16x1xf32>
    %159 = arith.divf %157, %158 : vector<16x1xf32>
    %160 = arith.mulf %154, %154 : vector<16x1xf32>
    %161 = arith.subf %159, %160 : vector<16x1xf32>
    %162 = vector.broadcast %154 : vector<16x1xf32> to vector<16x32xf32>
    %163 = arith.subf %150, %162 : vector<16x32xf32>
    %cst_67 = arith.constant 9.99999974E-6 : f32
    %164 = vector.broadcast %cst_67 : f32 to vector<16x1xf32>
    %165 = arith.addf %161, %164 : vector<16x1xf32>
    %166 = math.rsqrt %165 : vector<16x1xf32>
    %167 = vector.broadcast %166 : vector<16x1xf32> to vector<16x32xf32>
    %168 = arith.mulf %163, %167 : vector<16x32xf32>
    %169 = vector.broadcast %8 : vector<1x32xf32> to vector<16x32xf32>
    %170 = arith.mulf %168, %169 : vector<16x32xf32>
    %171 = vector.broadcast %9 : vector<1x32xf32> to vector<16x32xf32>
    %172 = arith.addf %170, %171 : vector<16x32xf32>
    %c1 = arith.constant 1 : index
    %c0_68 = arith.constant 0 : index
    %c0_69 = arith.constant 0 : index
    %173 = vector.load %arg8[%c1, %c0_68, %c0_69] : memref<2x6x32xf32, #tpu.memory_space<vmem>>, vector<1x6x32xf32>
    %174 = vector.shape_cast %173 : vector<1x6x32xf32> to vector<6x32xf32>
    %175 = vector.extract_strided_slice %174 {offsets = [0, 0], sizes = [1, 32], strides = [1, 1]} : vector<6x32xf32> to vector<1x32xf32>
    %176 = vector.extract_strided_slice %174 {offsets = [1, 0], sizes = [1, 32], strides = [1, 1]} : vector<6x32xf32> to vector<1x32xf32>
    %177 = vector.extract_strided_slice %174 {offsets = [2, 0], sizes = [1, 32], strides = [1, 1]} : vector<6x32xf32> to vector<1x32xf32>
    %178 = vector.extract_strided_slice %174 {offsets = [3, 0], sizes = [1, 32], strides = [1, 1]} : vector<6x32xf32> to vector<1x32xf32>
    %179 = vector.extract_strided_slice %174 {offsets = [4, 0], sizes = [1, 32], strides = [1, 1]} : vector<6x32xf32> to vector<1x32xf32>
    %180 = vector.extract_strided_slice %174 {offsets = [5, 0], sizes = [1, 32], strides = [1, 1]} : vector<6x32xf32> to vector<1x32xf32>
    %c1_70 = arith.constant 1 : index
    %c0_71 = arith.constant 0 : index
    %c0_72 = arith.constant 0 : index
    %181 = vector.load %arg2[%c1_70, %c0_71, %c0_72] : memref<2x32x96xf32, #tpu.memory_space<vmem>>, vector<1x32x96xf32>
    %182 = vector.shape_cast %181 : vector<1x32x96xf32> to vector<32x96xf32>
    %cst_73 = arith.constant dense<0.000000e+00> : vector<16x96xf32>
    %183 = tpu.matmul %172, %182, %cst_73 {dimension_numbers = #tpu.dot_dimension_numbers<[1], [0], [0], [1], [0, 0, 1, 1], [], []>} : vector<16x32xf32>, vector<32x96xf32>, vector<16x96xf32> -> vector<16x96xf32>
    %c1_74 = arith.constant 1 : index
    %c0_75 = arith.constant 0 : index
    %c0_76 = arith.constant 0 : index
    %184 = vector.load %arg3[%c1_74, %c0_75, %c0_76] : memref<2x1x96xf32, #tpu.memory_space<vmem>>, vector<1x1x96xf32>
    %185 = vector.shape_cast %184 : vector<1x1x96xf32> to vector<1x96xf32>
    %186 = vector.broadcast %185 : vector<1x96xf32> to vector<16x96xf32>
    %187 = arith.addf %183, %186 : vector<16x96xf32>
    %188 = vector.extract_strided_slice %187 {offsets = [0, 0], sizes = [16, 32], strides = [1, 1]} : vector<16x96xf32> to vector<16x32xf32>
    %189 = vector.extract_strided_slice %187 {offsets = [0, 32], sizes = [16, 32], strides = [1, 1]} : vector<16x96xf32> to vector<16x32xf32>
    %190 = vector.extract_strided_slice %187 {offsets = [0, 64], sizes = [16, 32], strides = [1, 1]} : vector<16x96xf32> to vector<16x32xf32>
    %191 = vector.extract_strided_slice %188 {offsets = [0, 0], sizes = [16, 8], strides = [1, 1]} : vector<16x32xf32> to vector<16x8xf32>
    %192 = vector.extract_strided_slice %189 {offsets = [0, 0], sizes = [16, 8], strides = [1, 1]} : vector<16x32xf32> to vector<16x8xf32>
    %193 = vector.extract_strided_slice %190 {offsets = [0, 0], sizes = [16, 8], strides = [1, 1]} : vector<16x32xf32> to vector<16x8xf32>
    %cst_77 = arith.constant dense<0.000000e+00> : vector<16x16xf32>
    %194 = tpu.matmul %191, %192, %cst_77 {dimension_numbers = #tpu.dot_dimension_numbers<[1], [1], [0], [0], [0, 0, 1, 0], [], []>} : vector<16x8xf32>, vector<16x8xf32>, vector<16x16xf32> -> vector<16x16xf32>
    %cst_78 = arith.constant 0.353553385 : f32
    %195 = vector.broadcast %cst_78 : f32 to vector<16x16xf32>
    %196 = arith.mulf %194, %195 : vector<16x16xf32>
    %197 = arith.addf %196, %1 : vector<16x16xf32>
    %cst_79 = arith.constant dense<0xFF800000> : vector<16xf32>
    %198 = vector.multi_reduction <maximumf>, %197, %cst_79 [1] : vector<16x16xf32> to vector<16xf32>
    %199 = vector.shape_cast %198 : vector<16xf32> to vector<16x1xf32>
    %200 = vector.broadcast %199 : vector<16x1xf32> to vector<16x16xf32>
    %201 = arith.subf %197, %200 : vector<16x16xf32>
    %202 = math.exp %201 : vector<16x16xf32>
    %cst_80 = arith.constant dense<0.000000e+00> : vector<16xf32>
    %203 = vector.multi_reduction <add>, %202, %cst_80 [1] : vector<16x16xf32> to vector<16xf32>
    %204 = vector.shape_cast %203 : vector<16xf32> to vector<16x1xf32>
    %205 = tpu.reciprocal %204 {approx = true} : vector<16x1xf32> -> vector<16x1xf32>
    %206 = vector.broadcast %205 : vector<16x1xf32> to vector<16x16xf32>
    %207 = arith.mulf %202, %206 : vector<16x16xf32>
    %cst_81 = arith.constant dense<0.000000e+00> : vector<16x8xf32>
    %208 = tpu.matmul %207, %193, %cst_81 {dimension_numbers = #tpu.dot_dimension_numbers<[1], [0], [0], [1], [0, 0, 1, 1], [], []>} : vector<16x16xf32>, vector<16x8xf32>, vector<16x8xf32> -> vector<16x8xf32>
    %c0_82 = arith.constant 0 : index
    %c0_83 = arith.constant 0 : index
    %209 = vector.load %arg11[%c0_82, %c0_83] : memref<16x32xf32, #tpu.memory_space<vmem>>, vector<16x8xf32>
    tpu.vector_store %arg11[%c0_82, %c0_83], %208 {strides = array<i32>} : memref<16x32xf32, #tpu.memory_space<vmem>>, vector<16x8xf32>,
    %210 = vector.extract_strided_slice %188 {offsets = [0, 8], sizes = [16, 8], strides = [1, 1]} : vector<16x32xf32> to vector<16x8xf32>
    %211 = vector.extract_strided_slice %189 {offsets = [0, 8], sizes = [16, 8], strides = [1, 1]} : vector<16x32xf32> to vector<16x8xf32>
    %212 = vector.extract_strided_slice %190 {offsets = [0, 8], sizes = [16, 8], strides = [1, 1]} : vector<16x32xf32> to vector<16x8xf32>
    %cst_84 = arith.constant dense<0.000000e+00> : vector<16x16xf32>
    %213 = tpu.matmul %210, %211, %cst_84 {dimension_numbers = #tpu.dot_dimension_numbers<[1], [1], [0], [0], [0, 0, 1, 0], [], []>} : vector<16x8xf32>, vector<16x8xf32>, vector<16x16xf32> -> vector<16x16xf32>
    %cst_85 = arith.constant 0.353553385 : f32
    %214 = vector.broadcast %cst_85 : f32 to vector<16x16xf32>
    %215 = arith.mulf %213, %214 : vector<16x16xf32>
    %216 = arith.addf %215, %1 : vector<16x16xf32>
    %cst_86 = arith.constant dense<0xFF800000> : vector<16xf32>
    %217 = vector.multi_reduction <maximumf>, %216, %cst_86 [1] : vector<16x16xf32> to vector<16xf32>
    %218 = vector.shape_cast %217 : vector<16xf32> to vector<16x1xf32>
    %219 = vector.broadcast %218 : vector<16x1xf32> to vector<16x16xf32>
    %220 = arith.subf %216, %219 : vector<16x16xf32>
    %221 = math.exp %220 : vector<16x16xf32>
    %cst_87 = arith.constant dense<0.000000e+00> : vector<16xf32>
    %222 = vector.multi_reduction <add>, %221, %cst_87 [1] : vector<16x16xf32> to vector<16xf32>
    %223 = vector.shape_cast %222 : vector<16xf32> to vector<16x1xf32>
    %224 = tpu.reciprocal %223 {approx = true} : vector<16x1xf32> -> vector<16x1xf32>
    %225 = vector.broadcast %224 : vector<16x1xf32> to vector<16x16xf32>
    %226 = arith.mulf %221, %225 : vector<16x16xf32>
    %cst_88 = arith.constant dense<0.000000e+00> : vector<16x8xf32>
    %227 = tpu.matmul %226, %212, %cst_88 {dimension_numbers = #tpu.dot_dimension_numbers<[1], [0], [0], [1], [0, 0, 1, 1], [], []>} : vector<16x16xf32>, vector<16x8xf32>, vector<16x8xf32> -> vector<16x8xf32>
    %c0_89 = arith.constant 0 : index
    %c8_90 = arith.constant 8 : index
    %228 = vector.load %arg11[%c0_89, %c8_90] : memref<16x32xf32, #tpu.memory_space<vmem>>, vector<16x8xf32>
    tpu.vector_store %arg11[%c0_89, %c8_90], %227 {strides = array<i32>} : memref<16x32xf32, #tpu.memory_space<vmem>>, vector<16x8xf32>,
    %229 = vector.extract_strided_slice %188 {offsets = [0, 16], sizes = [16, 8], strides = [1, 1]} : vector<16x32xf32> to vector<16x8xf32>
    %230 = vector.extract_strided_slice %189 {offsets = [0, 16], sizes = [16, 8], strides = [1, 1]} : vector<16x32xf32> to vector<16x8xf32>
    %231 = vector.extract_strided_slice %190 {offsets = [0, 16], sizes = [16, 8], strides = [1, 1]} : vector<16x32xf32> to vector<16x8xf32>
    %cst_91 = arith.constant dense<0.000000e+00> : vector<16x16xf32>
    %232 = tpu.matmul %229, %230, %cst_91 {dimension_numbers = #tpu.dot_dimension_numbers<[1], [1], [0], [0], [0, 0, 1, 0], [], []>} : vector<16x8xf32>, vector<16x8xf32>, vector<16x16xf32> -> vector<16x16xf32>
    %cst_92 = arith.constant 0.353553385 : f32
    %233 = vector.broadcast %cst_92 : f32 to vector<16x16xf32>
    %234 = arith.mulf %232, %233 : vector<16x16xf32>
    %235 = arith.addf %234, %1 : vector<16x16xf32>
    %cst_93 = arith.constant dense<0xFF800000> : vector<16xf32>
    %236 = vector.multi_reduction <maximumf>, %235, %cst_93 [1] : vector<16x16xf32> to vector<16xf32>
    %237 = vector.shape_cast %236 : vector<16xf32> to vector<16x1xf32>
    %238 = vector.broadcast %237 : vector<16x1xf32> to vector<16x16xf32>
    %239 = arith.subf %235, %238 : vector<16x16xf32>
    %240 = math.exp %239 : vector<16x16xf32>
    %cst_94 = arith.constant dense<0.000000e+00> : vector<16xf32>
    %241 = vector.multi_reduction <add>, %240, %cst_94 [1] : vector<16x16xf32> to vector<16xf32>
    %242 = vector.shape_cast %241 : vector<16xf32> to vector<16x1xf32>
    %243 = tpu.reciprocal %242 {approx = true} : vector<16x1xf32> -> vector<16x1xf32>
    %244 = vector.broadcast %243 : vector<16x1xf32> to vector<16x16xf32>
    %245 = arith.mulf %240, %244 : vector<16x16xf32>
    %cst_95 = arith.constant dense<0.000000e+00> : vector<16x8xf32>
    %246 = tpu.matmul %245, %231, %cst_95 {dimension_numbers = #tpu.dot_dimension_numbers<[1], [0], [0], [1], [0, 0, 1, 1], [], []>} : vector<16x16xf32>, vector<16x8xf32>, vector<16x8xf32> -> vector<16x8xf32>
    %c0_96 = arith.constant 0 : index
    %c16_97 = arith.constant 16 : index
    %247 = vector.load %arg11[%c0_96, %c16_97] : memref<16x32xf32, #tpu.memory_space<vmem>>, vector<16x8xf32>
    tpu.vector_store %arg11[%c0_96, %c16_97], %246 {strides = array<i32>} : memref<16x32xf32, #tpu.memory_space<vmem>>, vector<16x8xf32>,
    %248 = vector.extract_strided_slice %188 {offsets = [0, 24], sizes = [16, 8], strides = [1, 1]} : vector<16x32xf32> to vector<16x8xf32>
    %249 = vector.extract_strided_slice %189 {offsets = [0, 24], sizes = [16, 8], strides = [1, 1]} : vector<16x32xf32> to vector<16x8xf32>
    %250 = vector.extract_strided_slice %190 {offsets = [0, 24], sizes = [16, 8], strides = [1, 1]} : vector<16x32xf32> to vector<16x8xf32>
    %cst_98 = arith.constant dense<0.000000e+00> : vector<16x16xf32>
    %251 = tpu.matmul %248, %249, %cst_98 {dimension_numbers = #tpu.dot_dimension_numbers<[1], [1], [0], [0], [0, 0, 1, 0], [], []>} : vector<16x8xf32>, vector<16x8xf32>, vector<16x16xf32> -> vector<16x16xf32>
    %cst_99 = arith.constant 0.353553385 : f32
    %252 = vector.broadcast %cst_99 : f32 to vector<16x16xf32>
    %253 = arith.mulf %251, %252 : vector<16x16xf32>
    %254 = arith.addf %253, %1 : vector<16x16xf32>
    %cst_100 = arith.constant dense<0xFF800000> : vector<16xf32>
    %255 = vector.multi_reduction <maximumf>, %254, %cst_100 [1] : vector<16x16xf32> to vector<16xf32>
    %256 = vector.shape_cast %255 : vector<16xf32> to vector<16x1xf32>
    %257 = vector.broadcast %256 : vector<16x1xf32> to vector<16x16xf32>
    %258 = arith.subf %254, %257 : vector<16x16xf32>
    %259 = math.exp %258 : vector<16x16xf32>
    %cst_101 = arith.constant dense<0.000000e+00> : vector<16xf32>
    %260 = vector.multi_reduction <add>, %259, %cst_101 [1] : vector<16x16xf32> to vector<16xf32>
    %261 = vector.shape_cast %260 : vector<16xf32> to vector<16x1xf32>
    %262 = tpu.reciprocal %261 {approx = true} : vector<16x1xf32> -> vector<16x1xf32>
    %263 = vector.broadcast %262 : vector<16x1xf32> to vector<16x16xf32>
    %264 = arith.mulf %259, %263 : vector<16x16xf32>
    %cst_102 = arith.constant dense<0.000000e+00> : vector<16x8xf32>
    %265 = tpu.matmul %264, %250, %cst_102 {dimension_numbers = #tpu.dot_dimension_numbers<[1], [0], [0], [1], [0, 0, 1, 1], [], []>} : vector<16x16xf32>, vector<16x8xf32>, vector<16x8xf32> -> vector<16x8xf32>
    %c0_103 = arith.constant 0 : index
    %c24_104 = arith.constant 24 : index
    %266 = vector.load %arg11[%c0_103, %c24_104] : memref<16x32xf32, #tpu.memory_space<vmem>>, vector<16x8xf32>
    tpu.vector_store %arg11[%c0_103, %c24_104], %265 {strides = array<i32>} : memref<16x32xf32, #tpu.memory_space<vmem>>, vector<16x8xf32>,
    %c0_105 = arith.constant 0 : index
    %c0_106 = arith.constant 0 : index
    %267 = vector.load %arg11[%c0_105, %c0_106] : memref<16x32xf32, #tpu.memory_space<vmem>>, vector<16x32xf32>
    %c1_107 = arith.constant 1 : index
    %c0_108 = arith.constant 0 : index
    %c0_109 = arith.constant 0 : index
    %268 = vector.load %arg4[%c1_107, %c0_108, %c0_109] : memref<2x32x32xf32, #tpu.memory_space<vmem>>, vector<1x32x32xf32>
    %269 = vector.shape_cast %268 : vector<1x32x32xf32> to vector<32x32xf32>
    %cst_110 = arith.constant dense<0.000000e+00> : vector<16x32xf32>
    %270 = tpu.matmul %267, %269, %cst_110 {dimension_numbers = #tpu.dot_dimension_numbers<[1], [0], [0], [1], [0, 0, 1, 1], [], []>} : vector<16x32xf32>, vector<32x32xf32>, vector<16x32xf32> -> vector<16x32xf32>
    %271 = vector.broadcast %175 : vector<1x32xf32> to vector<16x32xf32>
    %272 = arith.addf %270, %271 : vector<16x32xf32>
    %273 = arith.addf %172, %272 : vector<16x32xf32>
    %cst_111 = arith.constant dense<0.000000e+00> : vector<16xf32>
    %274 = vector.multi_reduction <add>, %273, %cst_111 [1] : vector<16x32xf32> to vector<16xf32>
    %275 = vector.shape_cast %274 : vector<16xf32> to vector<16x1xf32>
    %cst_112 = arith.constant 3.200000e+01 : f32
    %276 = vector.broadcast %cst_112 : f32 to vector<16x1xf32>
    %277 = arith.divf %275, %276 : vector<16x1xf32>
    %278 = arith.mulf %273, %273 : vector<16x32xf32>
    %cst_113 = arith.constant dense<0.000000e+00> : vector<16xf32>
    %279 = vector.multi_reduction <add>, %278, %cst_113 [1] : vector<16x32xf32> to vector<16xf32>
    %280 = vector.shape_cast %279 : vector<16xf32> to vector<16x1xf32>
    %cst_114 = arith.constant 3.200000e+01 : f32
    %281 = vector.broadcast %cst_114 : f32 to vector<16x1xf32>
    %282 = arith.divf %280, %281 : vector<16x1xf32>
    %283 = arith.mulf %277, %277 : vector<16x1xf32>
    %284 = arith.subf %282, %283 : vector<16x1xf32>
    %285 = vector.broadcast %277 : vector<16x1xf32> to vector<16x32xf32>
    %286 = arith.subf %273, %285 : vector<16x32xf32>
    %cst_115 = arith.constant 9.99999974E-6 : f32
    %287 = vector.broadcast %cst_115 : f32 to vector<16x1xf32>
    %288 = arith.addf %284, %287 : vector<16x1xf32>
    %289 = math.rsqrt %288 : vector<16x1xf32>
    %290 = vector.broadcast %289 : vector<16x1xf32> to vector<16x32xf32>
    %291 = arith.mulf %286, %290 : vector<16x32xf32>
    %292 = vector.broadcast %176 : vector<1x32xf32> to vector<16x32xf32>
    %293 = arith.mulf %291, %292 : vector<16x32xf32>
    %294 = vector.broadcast %177 : vector<1x32xf32> to vector<16x32xf32>
    %295 = arith.addf %293, %294 : vector<16x32xf32>
    %c1_116 = arith.constant 1 : index
    %c0_117 = arith.constant 0 : index
    %c0_118 = arith.constant 0 : index
    %296 = vector.load %arg5[%c1_116, %c0_117, %c0_118] : memref<2x32x64xf32, #tpu.memory_space<vmem>>, vector<1x32x64xf32>
    %297 = vector.shape_cast %296 : vector<1x32x64xf32> to vector<32x64xf32>
    %cst_119 = arith.constant dense<0.000000e+00> : vector<16x64xf32>
    %298 = tpu.matmul %295, %297, %cst_119 {dimension_numbers = #tpu.dot_dimension_numbers<[1], [0], [0], [1], [0, 0, 1, 1], [], []>} : vector<16x32xf32>, vector<32x64xf32>, vector<16x64xf32> -> vector<16x64xf32>
    %c1_120 = arith.constant 1 : index
    %c0_121 = arith.constant 0 : index
    %c0_122 = arith.constant 0 : index
    %299 = vector.load %arg6[%c1_120, %c0_121, %c0_122] : memref<2x1x64xf32, #tpu.memory_space<vmem>>, vector<1x1x64xf32>
    %300 = vector.shape_cast %299 : vector<1x1x64xf32> to vector<1x64xf32>
    %301 = vector.broadcast %300 : vector<1x64xf32> to vector<16x64xf32>
    %302 = arith.addf %298, %301 : vector<16x64xf32>
    %303 = arith.mulf %302, %302 : vector<16x64xf32>
    %304 = arith.mulf %302, %303 : vector<16x64xf32>
    %cst_123 = arith.constant 4.471500e-02 : f32
    %305 = vector.broadcast %cst_123 : f32 to vector<16x64xf32>
    %306 = arith.mulf %305, %304 : vector<16x64xf32>
    %307 = arith.addf %302, %306 : vector<16x64xf32>
    %cst_124 = arith.constant 0.797884583 : f32
    %308 = vector.broadcast %cst_124 : f32 to vector<16x64xf32>
    %309 = arith.mulf %308, %307 : vector<16x64xf32>
    %310 = math.tanh %309 : vector<16x64xf32>
    %cst_125 = arith.constant 1.000000e+00 : f32
    %311 = vector.broadcast %cst_125 : f32 to vector<16x64xf32>
    %312 = arith.addf %311, %310 : vector<16x64xf32>
    %cst_126 = arith.constant 5.000000e-01 : f32
    %313 = vector.broadcast %cst_126 : f32 to vector<16x64xf32>
    %314 = arith.mulf %313, %312 : vector<16x64xf32>
    %315 = arith.mulf %302, %314 : vector<16x64xf32>
    %c1_127 = arith.constant 1 : index
    %c0_128 = arith.constant 0 : index
    %c0_129 = arith.constant 0 : index
    %316 = vector.load %arg7[%c1_127, %c0_128, %c0_129] : memref<2x64x32xf32, #tpu.memory_space<vmem>>, vector<1x64x32xf32>
    %317 = vector.shape_cast %316 : vector<1x64x32xf32> to vector<64x32xf32>
    %cst_130 = arith.constant dense<0.000000e+00> : vector<16x32xf32>
    %318 = tpu.matmul %315, %317, %cst_130 {dimension_numbers = #tpu.dot_dimension_numbers<[1], [0], [0], [1], [0, 0, 1, 1], [], []>} : vector<16x64xf32>, vector<64x32xf32>, vector<16x32xf32> -> vector<16x32xf32>
    %319 = vector.broadcast %178 : vector<1x32xf32> to vector<16x32xf32>
    %320 = arith.addf %318, %319 : vector<16x32xf32>
    %321 = arith.addf %295, %320 : vector<16x32xf32>
    %cst_131 = arith.constant dense<0.000000e+00> : vector<16xf32>
    %322 = vector.multi_reduction <add>, %321, %cst_131 [1] : vector<16x32xf32> to vector<16xf32>
    %323 = vector.shape_cast %322 : vector<16xf32> to vector<16x1xf32>
    %cst_132 = arith.constant 3.200000e+01 : f32
    %324 = vector.broadcast %cst_132 : f32 to vector<16x1xf32>
    %325 = arith.divf %323, %324 : vector<16x1xf32>
    %326 = arith.mulf %321, %321 : vector<16x32xf32>
    %cst_133 = arith.constant dense<0.000000e+00> : vector<16xf32>
    %327 = vector.multi_reduction <add>, %326, %cst_133 [1] : vector<16x32xf32> to vector<16xf32>
    %328 = vector.shape_cast %327 : vector<16xf32> to vector<16x1xf32>
    %cst_134 = arith.constant 3.200000e+01 : f32
    %329 = vector.broadcast %cst_134 : f32 to vector<16x1xf32>
    %330 = arith.divf %328, %329 : vector<16x1xf32>
    %331 = arith.mulf %325, %325 : vector<16x1xf32>
    %332 = arith.subf %330, %331 : vector<16x1xf32>
    %333 = vector.broadcast %325 : vector<16x1xf32> to vector<16x32xf32>
    %334 = arith.subf %321, %333 : vector<16x32xf32>
    %cst_135 = arith.constant 9.99999974E-6 : f32
    %335 = vector.broadcast %cst_135 : f32 to vector<16x1xf32>
    %336 = arith.addf %332, %335 : vector<16x1xf32>
    %337 = math.rsqrt %336 : vector<16x1xf32>
    %338 = vector.broadcast %337 : vector<16x1xf32> to vector<16x32xf32>
    %339 = arith.mulf %334, %338 : vector<16x32xf32>
    %340 = vector.broadcast %179 : vector<1x32xf32> to vector<16x32xf32>
    %341 = arith.mulf %339, %340 : vector<16x32xf32>
    %342 = vector.broadcast %180 : vector<1x32xf32> to vector<16x32xf32>
    %343 = arith.addf %341, %342 : vector<16x32xf32>
    %344 = tpu.iota {dimensions = array<i32: 0>} : vector<2x16xi32>
    %345 = tpu.iota {dimensions = array<i32: 1>} : vector<2x16xi32>
    %c8_i32 = arith.constant 8 : i32
    %346 = vector.broadcast %c8_i32 : i32 to vector<2x16xi32>
    %347 = arith.muli %344, %346 : vector<2x16xi32>
    %348 = arith.cmpi eq, %345, %347 : vector<2x16xi32>
    %349 = arith.extui %348 : vector<2x16xi1> to vector<2x16xi32>
    %350 = arith.sitofp %349 : vector<2x16xi32> to vector<2x16xf32>
    %cst_136 = arith.constant dense<0.000000e+00> : vector<2x32xf32>
    %351 = tpu.matmul %350, %343, %cst_136 {dimension_numbers = #tpu.dot_dimension_numbers<[1], [0], [0], [1], [0, 0, 1, 1], [], []>} : vector<2x16xf32>, vector<16x32xf32>, vector<2x32xf32> -> vector<2x32xf32>
    %c0_137 = arith.constant 0 : index
    %c0_138 = arith.constant 0 : index
    %352 = vector.load %arg9[%c0_137, %c0_138] : memref<32x16xf32, #tpu.memory_space<vmem>>, vector<32x16xf32>
    %cst_139 = arith.constant dense<0.000000e+00> : vector<2x16xf32>
    %353 = tpu.matmul %351, %352, %cst_139 {dimension_numbers = #tpu.dot_dimension_numbers<[1], [0], [0], [1], [0, 0, 1, 1], [], []>} : vector<2x32xf32>, vector<32x16xf32>, vector<2x16xf32> -> vector<2x16xf32>
    %c0_140 = arith.constant 0 : index
    %c0_141 = arith.constant 0 : index
    %354 = vector.load %arg10[%c0_140, %c0_141] : memref<2x16xf32, #tpu.memory_space<vmem>>, vector<2x16xf32>
    tpu.vector_store %arg10[%c0_140, %c0_141], %353 {strides = array<i32>} : memref<2x16xf32, #tpu.memory_space<vmem>>, vector<2x16xf32>,
    return
  }
}

</mosaic_0001>

<bundles_post_ra>
// kernel: tpu_custom_call.1
= control target key start
LH: loop header
LB: loop body
LE: loop exit
PB: predicated region body
PF: predicated region fallthrough
CT: control target
= control target key end

     0   :  { %15 = vsyncpa [#allocation4], 0  ;;  %s2516_s0 = inlined_call_operand.hbm [shape: f32[16,32], index: 0, kind: input, shape index: {}]   ;;  %s2517_s1 = inlined_call_operand.hbm [shape: f32[16,16], index: 1, kind: input, shape index: {}]   ;;  %s2518_s2 = inlined_call_operand.vmem [shape: f32[2,32,96], index: 2, kind: input, shape index: {}]   ;;  %s2519_s3 = inlined_call_operand.vmem [shape: f32[2,1,96], index: 3, kind: input, shape index: {}]   ;;  %s2520_s4 = inlined_call_operand.vmem [shape: f32[2,32,32], index: 4, kind: input, shape index: {}]   ;;  %s2521_s5 = inlined_call_operand.vmem [shape: f32[2,32,64], index: 5, kind: input, shape index: {}]   ;;  %s2522_s6 = inlined_call_operand.hbm [shape: f32[2,1,64], index: 6, kind: input, shape index: {}]   ;;  %s2523_s7 = inlined_call_operand.vmem [shape: f32[2,64,32], index: 7, kind: input, shape index: {}]   ;;  %s2524_s8 = inlined_call_operand.vmem [shape: f32[2,6,32], index: 8, kind: input, shape index: {}]   ;;  %s2525_s9 = inlined_call_operand.vmem [shape: f32[32,16], index: 9, kind: input, shape index: {}]   ;;  %s2526_s10 = inlined_call_operand.hbm [shape: f32[2,16], index: 10, kind: output, shape index: {}]  }
   0x1   :  { %16 = vsyncpa [#allocation7], 0 }
   0x2   :  { %17 = vsyncpa [#allocation5], 0  ;;  %s35_s15 = sshll.u32 %s2517_s1, 4  ;;  %s1951_s16 = smov [#allocation6]   ;;  %s36_s15 = int_to_ptr.hbm [resolvable:$true] %s35_s15 }
   0x3   :  { %s37_s17 = sshll.u32 %s1951_s16, 4  ;;  %s22_s20 = sshll.u32 %s2516_s0, 4  ;;  %s38_s17 = int_to_ptr.vmem [resolvable:$true] %s37_s17  ;;  %s23_s20 = int_to_ptr.hbm [resolvable:$true] %s22_s20 }
   0x4   :  { %s1952_s21 = smov 128   ;;  %s1953_s22 = smov 8  }
   0x5   :  { %43 = dma.hbm_to_vmem [thread:$0]  %s36_s15, 256, %s38_s17, [#allocation7], %s1952_s21, %s1952_s21, %s1953_s22  }
   0x6   :  { %s1954_s23 = smov [#allocation3]   ;;  %s56_s27 = sshll.u32 %s2522_s6, 4  ;;  %s57_s27 = int_to_ptr.hbm [resolvable:$true] %s56_s27 }
   0x7   :  { %s24_s24 = sshll.u32 %s1954_s23, 4  ;;  %s1955_s1 = smov [#allocation8]   ;;  %s25_s24 = int_to_ptr.vmem [resolvable:$true] %s24_s24 }
   0x8   :  { %30 = dma.hbm_to_vmem [thread:$0]  %s23_s20, 256, %s25_s24, [#allocation4], %s1952_s21, %s1952_s21, %s1953_s22  }
   0x9   :  { %s58_s28 = sshll.u32 %s1955_s1, 4  ;;  %s2527_s29 = smov 16   ;;  %s59_s28 = int_to_ptr.vmem [resolvable:$true] %s58_s28 }
   0xa   :  { %s1957_s0 = smov 1  }
   0xb   :  { %64 = dma.hbm_to_vmem [thread:$0]  %s57_s27, 32, %s59_s28, [#allocation7], %s2527_s29, %s2527_s29, %s1957_s0  }
   0xc   :  { %1945 = dma.done.wait [#allocation4], 256  }
   0xd   :  { %1946 = vsyncadd [#allocation4], 4294967040 }
   0xe   :  { %1947 = dma.done.wait [#allocation7], 288  }
   0xf   :  { %1948 = vsyncadd [#allocation7], 4294967008  ;;  %v91_v0 = vld [vmem:[%s2518_s2 + $0x18] sm:$0xff]  ;;  %v90_v1 = vld [vmem:[%s2518_s2 + $0x10] sm:$0xff]  ;;  %vm96_vm0 = vcmask 261120   ;;  %s1958_s19 = smov 120  }
  0x10   :  { %115 = vmatpush.msra.mxu0 %v91_v0  ;;  %v89_v2 = vld [vmem:[%s2518_s2 + $0x8] sm:$0xff]  ;;  %v88_v3 = vld [vmem:[%s2518_s2] sm:$0xff]  ;;  %v2053_v4 = vld [vmem:[#allocation3] sm:$0xff]  ;;  %s1959_s20 = smov 88   ;;  %s1960_s21 = smov 96   ;;  %vm132_vm1 = vcmask 64512  }
  0x11   :  { %v2057_v5 = vld [vmem:[#allocation3 + $0x8] sm:$0xff]  ;;  %v1755_v6 = vld [vmem:[%s2519_s3] ss:$0 sm:$0xff]  ;;  %s1961_s23 = smov 104   ;;  %s1962_s24 = smov 72   ;;  %vm168_vm2 = vcmask 130048  }
  0x12   :  { %116 = vmatpush.msra.mxu0 %v90_v1  ;;  %s1963_s25 = smov 80   ;;  %s1964_s26 = smov 112   ;;  %v2114_v26 = vld [vmem:[#allocation6] sm:$0xff]  ;;  %v2122_v42 = vld [vmem:[#allocation6 + $0x8] sm:$0xff]  ;;  %vm336_vm3 = vcmask 130112   ;;  %vm447_vm4 = vcmask 195712  }
  0x13   :  { %s1965_s27 = smov 64   ;;  %s1966_s1 = smov 40   ;;  %vm558_vm5 = vcmask 261312   ;;  %vm724_vm13 = vcmask 523264  }
  0x14   :  { %117 = vmatpush.msra.mxu0 %v89_v2  ;;  %s1967_s28 = smov 56   ;;  %s1968_s0 = smov 48  }
  0x15   :  { %s1969_s30 = smov 24  }
  0x16   :  { %118 = vmatpush.msra.mxu0 %v88_v3 }
  0x17   :  { %1604 = vmatmul.msk.f32.vlgmr.msra.gmra.mxu0 %vm96_vm0, %v2053_v4 }
  0x1f   :  { %1605 = vmatmul.msk.f32.gmra.mxu0 %vm96_vm0, %v2057_v5 }
  0x94   :  { %v120_v7 = vpop.f32.mrf.mxu0 }
  0x95   :  { %v2064_v8 = vadd.f32 %v1755_v6, %v120_v7 }
  0x97   :  { %228 = vrot.lane.b32.xlu2 %v2064_v8, %s1958_s19 }
  0x9c   :  { %v123_v9 = vpop.f32.mrf.mxu0 }
  0x9d   :  { %v2068_v10 = vadd.f32 %v1755_v6, %v123_v9 }
  0x9f   :  { %234 = vrot.lane.b32.xlu1 %v2068_v10, %s1959_s20  ;;  %130 = vrot.lane.b32.xlu0 %v2068_v10, %s1960_s21  ;;  %v1715_v59 = vpack.i.bf16 %v2064_v8, %v2068_v10 }
  0xa0   :  { %230 = vrot.lane.b32.xlu2 %v2068_v10, %s1958_s19 }
  0xa7   :  { %232 = vrot.lane.b32.xlu1 %v2064_v8, %s1959_s20  ;;  %128 = vrot.lane.b32.xlu0 %v2064_v8, %s1960_s21 }
  0xa8   :  { %450 = vrot.lane.b32.xlu2 %v2064_v8, %s1961_s23 }
  0xaf   :  { %454 = vrot.lane.b32.xlu1 %v2064_v8, %s1962_s24  ;;  %456 = vrot.lane.b32.xlu0 %v2068_v10, %s1962_s24 }
  0xb0   :  { %452 = vrot.lane.b32.xlu2 %v2068_v10, %s1961_s23 }
  0xb7   :  { %343 = vrot.lane.b32.xlu1 %v2064_v8, %s1963_s25  ;;  %345 = vrot.lane.b32.xlu0 %v2068_v10, %s1963_s25 }
  0xbf   :  { %341 = vrot.lane.b32.xlu1 %v2068_v10, %s1964_s26  ;;  %339 = vrot.lane.b32.xlu0 %v2064_v8, %s1964_s26 }
  0xf1   :  { %v229_v13 = vpop.permute.xlu2 %228 }
  0xfa   :  { %v231_v16 = vpop.permute.xlu2 %230 }
 0x102   :  { %v451_v20 = vpop.permute.xlu2 %450 }
 0x10a   :  { %v453_v23 = vpop.permute.xlu2 %452 }
 0x111   :  { %v235_v11 = vpop.permute.xlu1 %234  ;;  %v131_v12 = vpop.permute.xlu0 %130 }
 0x112   :  { %1606 = vmatpush.xpose.msk.msra.mxu1 %vm132_vm1, %v131_v12  ;;  %1612 = vmatpush.xpose.msk.msra.mxu3 %vm132_vm1, %v235_v11 }
 0x119   :  { %v233_v14 = vpop.permute.xlu1 %232  ;;  %v129_v15 = vpop.permute.xlu0 %128 }
 0x11a   :  { %1607 = vmatpush.xpose.msk.msra.mxu1 %vm132_vm1, %v129_v15  ;;  %1613 = vmatpush.xpose.msk.msra.mxu3 %vm132_vm1, %v233_v14 }
 0x11d   :  { %1608 = vmatmul.msk.f32.vlgmr.msra.gmra.mxu1 %vm132_vm1, %v2064_v8  ;;  %1614 = vmatmul.msk.f32.vlgmr.msra.gmra.mxu3 %vm132_vm1, %v229_v13 }
 0x121   :  { %v457_v17 = vpop.permute.xlu0 %456  ;;  %v455_v18 = vpop.permute.xlu1 %454 }
 0x122   :  { %1624 = vmatpush.xpose.msk.msrb.mxu3 %vm132_vm1, %v457_v17 }
 0x125   :  { %1609 = vmatmul.msk.f32.gmra.mxu1 %vm132_vm1, %v2068_v10  ;;  %1615 = vmatmul.msk.f32.gmra.mxu3 %vm132_vm1, %v231_v16 }
 0x126   :  { %1625 = vmatpush.xpose.msk.msrb.mxu3 %vm132_vm1, %v455_v18 }
 0x129   :  { %v346_v19 = vpop.permute.xlu0 %345  ;;  %v344_v21 = vpop.permute.xlu1 %343 }
 0x12a   :  { %1618 = vmatpush.xpose.msk.msrb.mxu0 %vm132_vm1, %v346_v19 }
 0x12d   :  { %1626 = vmatmul.msk.f32.vlgmr.msrb.gmra.mxu3 %vm132_vm1, %v451_v20 }
 0x12e   :  { %1619 = vmatpush.xpose.msk.msrb.mxu0 %vm132_vm1, %v344_v21 }
 0x131   :  { %v340_v22 = vpop.permute.xlu0 %339  ;;  %v342_v24 = vpop.permute.xlu1 %341 }
 0x132   :  { %1620 = vmatmul.msk.f32.vlgmr.msrb.gmra.mxu0 %vm132_vm1, %v340_v22 }
 0x135   :  { %1627 = vmatmul.msk.f32.gmra.mxu3 %vm132_vm1, %v453_v23 }
 0x13a   :  { %1621 = vmatmul.msk.f32.gmra.mxu0 %vm132_vm1, %v342_v24 }
 0x19a   :  { %v158_v25 = vpop.f32.mrf.mxu1 }
 0x19b   :  { %v164_v27 = vmul.f32 0.35355338, %v158_v25 }
 0x19d   :  { %v166_v28 = vadd.f32 %v164_v27, %v2114_v26 }
 0x19f   :  { %v169_v29 = vsel %vm168_vm2, %v166_v28, -inf }
 0x1a0   :  { %v261_v30 = vpop.f32.mrf.mxu3  ;;  %170 = vmax.xlane.f32.xlu2 %v169_v29 }
 0x1a1   :  { %v267_v31 = vmul.f32 0.35355338, %v261_v30 }
 0x1a2   :  { %v161_v38 = vpop.f32.mrf.mxu1 }
 0x1a3   :  { %v269_v32 = vadd.f32 %v267_v31, %v2114_v26  ;;  %v165_v40 = vmul.f32 0.35355338, %v161_v38 }
 0x1a5   :  { %v271_v33 = vsel %vm168_vm2, %v269_v32, -inf  ;;  %v167_v46 = vadd.f32 %v165_v40, %v2122_v42 }
 0x1a6   :  { %272 = vmax.xlane.f32.xlu1 %v271_v33 }
 0x1a7   :  { %v172_v51 = vsel %vm168_vm2, %v167_v46, -inf }
 0x1a8   :  { %v264_v34 = vpop.f32.mrf.mxu3 }
 0x1a9   :  { %v268_v50 = vmul.f32 0.35355338, %v264_v34 }
 0x1ab   :  { %v270_v54 = vadd.f32 %v268_v50, %v2122_v42 }
 0x1ad   :  { %v274_v56 = vsel %vm168_vm2, %v270_v54, -inf }
 0x1af   :  { %v372_v35 = vpop.f32.mrf.mxu0 }
 0x1b0   :  { %v378_v36 = vmul.f32 0.35355338, %v372_v35  ;;  %v483_v37 = vpop.f32.mrf.mxu3 }
 0x1b1   :  { %v489_v55 = vmul.f32 0.35355338, %v483_v37 }
 0x1b2   :  { %v380_v39 = vadd.f32 %v378_v36, %v2114_v26 }
 0x1b3   :  { %v491_v57 = vadd.f32 %v489_v55, %v2114_v26 }
 0x1b4   :  { %v382_v41 = vsel %vm168_vm2, %v380_v39, -inf }
 0x1b5   :  { %383 = vmax.xlane.f32.xlu0 %v382_v41  ;;  %v493_v58 = vsel %vm168_vm2, %v491_v57, -inf }
 0x1b7   :  { %v375_v43 = vpop.f32.mrf.mxu0 }
 0x1b8   :  { %v379_v44 = vmul.f32 0.35355338, %v375_v43  ;;  %v486_v45 = vpop.f32.mrf.mxu3 }
 0x1b9   :  { %v490_v47 = vmul.f32 0.35355338, %v486_v45 }
 0x1ba   :  { %v2126_v48 = vadd.f32 %v379_v44, %v2122_v42 }
 0x1bb   :  { %v2129_v49 = vadd.f32 %v490_v47, %v2122_v42 }
 0x1bc   :  { %v385_v52 = vsel %vm168_vm2, %v2126_v48, -inf }
 0x1bd   :  { %173 = vmax.xlane.f32.xlu0 %v172_v51  ;;  %386 = vmax.xlane.f32.xlu2 %v385_v52  ;;  %v496_v53 = vsel %vm168_vm2, %v2129_v49, -inf }
 0x1be   :  { %497 = vmax.xlane.f32.xlu1 %v496_v53 }
 0x1c5   :  { %275 = vmax.xlane.f32.xlu2 %v274_v56 }
 0x1cd   :  { %494 = vmax.xlane.f32.xlu2 %v493_v58 }
 0x1d7   :  { %1716 = vrot.lane.b32.xlu1 %v1715_v59, %s1965_s27 }
 0x213   :  { %v171_v60 = vpop.xlane.xlu2 %170 }
 0x214   :  { %v175_v61 = vsub.f32 %v166_v28, %v171_v60 }
 0x216   :  { %v177_v62 = vmul.f32 1.442695, %v175_v61 }
 0x218   :  { %1759 = vpow2.f32 %v177_v62 }
 0x219   :  { %v273_v63 = vpop.xlane.xlu1 %272 }
 0x21a   :  { %v277_v0 = vsub.f32 %v269_v32, %v273_v63 }
 0x21c   :  { %v279_v1 = vmul.f32 1.442695, %v277_v0 }
 0x21e   :  { %v1760_v2 = vpop.eup %1759  ;;  %1761 = vpow2.f32 %v279_v1 }
 0x21f   :  { %v181_v3 = vsel %vm168_vm2, %v1760_v2, 0.0 }
 0x220   :  { %182 = vadd.xlane.f32.xlu0 %v181_v3 }
 0x224   :  { %v2144_v6 = vpop.eup %1761 }
 0x225   :  { %v283_v7 = vsel %vm168_vm2, %v2144_v6, 0.0 }
 0x228   :  { %284 = vadd.xlane.f32.xlu0 %v283_v7  ;;  %v384_v8 = vpop.xlane.xlu0 %383 }
 0x229   :  { %v388_v9 = vsub.f32 %v380_v39, %v384_v8 }
 0x22b   :  { %v390_v10 = vmul.f32 1.442695, %v388_v9 }
 0x22d   :  { %1763 = vpow2.f32 %v390_v10 }
 0x230   :  { %v174_v11 = vpop.xlane.xlu0 %173  ;;  %v387_v19 = vpop.xlane.xlu2 %386 }
 0x231   :  { %v176_v12 = vsub.f32 %v167_v46, %v174_v11  ;;  %v498_v18 = vpop.xlane.xlu1 %497  ;;  %v389_v40 = vsub.f32 %v2126_v48, %v387_v19 }
 0x232   :  { %v500_v33 = vsub.f32 %v2129_v49, %v498_v18 }
 0x233   :  { %v2148_v13 = vpop.eup %1763  ;;  %v179_v14 = vmul.f32 1.442695, %v176_v12  ;;  %v392_v43 = vmul.f32 1.442695, %v389_v40 }
 0x234   :  { %v394_v15 = vsel %vm168_vm2, %v2148_v13, 0.0  ;;  %v503_v35 = vmul.f32 1.442695, %v500_v33 }
 0x235   :  { %1765 = vpow2.f32 %v179_v14  ;;  %395 = vadd.xlane.f32.xlu1 %v394_v15 }
 0x238   :  { %v276_v23 = vpop.xlane.xlu2 %275 }
 0x239   :  { %v278_v24 = vsub.f32 %v270_v54, %v276_v23  ;;  %v566_v23 = vld [vmem:[%s2520_s4 + $0x18] sm:$0xff] }
 0x23a   :  { %586 = vmatpush.msra.mxu0 %v566_v23 }
 0x23b   :  { %v1766_v16 = vpop.eup %1765  ;;  %v281_v25 = vmul.f32 1.442695, %v278_v24  ;;  %v565_v24 = vld [vmem:[%s2520_s4 + $0x10] sm:$0xff] }
 0x23c   :  { %1726 = vrot.lane.b32.xlu0 %v1715_v59, %s1966_s1  ;;  %v184_v17 = vsel %vm168_vm2, %v1766_v16, 0.0  ;;  %587 = vmatpush.msra.mxu0 %v565_v24 }
 0x23d   :  { %185 = vadd.xlane.f32.xlu2 %v184_v17  ;;  %1767 = vpow2.f32 %v281_v25  ;;  %v564_v25 = vld [vmem:[%s2520_s4 + $0x8] sm:$0xff] }
 0x23e   :  { %588 = vmatpush.msra.mxu0 %v564_v25 }
 0x240   :  { %v495_v27 = vpop.xlane.xlu2 %494 }
 0x241   :  { %v499_v28 = vsub.f32 %v491_v57, %v495_v27  ;;  %v563_v27 = vld [vmem:[%s2520_s4] sm:$0xff] }
 0x242   :  { %589 = vmatpush.msra.mxu0 %v563_v27 }
 0x243   :  { %v501_v29 = vmul.f32 1.442695, %v499_v28  ;;  %v1768_v30 = vpop.eup %1767 }
 0x244   :  { %v286_v31 = vsel %vm168_vm2, %v1768_v30, 0.0 }
 0x245   :  { %1769 = vpow2.f32 %v501_v29 }
 0x246   :  { %1771 = vpow2.f32 %v503_v35  ;;  %v2203_v35 = vld [vmem:[%s2524_s8] sm:$0x3f] }
 0x249   :  { %v1717_v20 = vpop.permute.xlu1 %1716 }
 0x24a   :  { %v1718_v21 = vunpack.i.l.bf16 %v1717_v20  ;;  %v1719_v22 = vunpack.i.h.bf16 %v1717_v20 }
 0x24b   :  { %v1770_v32 = vpop.eup %1769 }
 0x24c   :  { %217 = vmatpush.msra.mxu2 %v1718_v21  ;;  %v505_v34 = vsel %vm168_vm2, %v1770_v32, 0.0  ;;  %v1772_v36 = vpop.eup %1771 }
 0x24d   :  { %v508_v37 = vsel %vm168_vm2, %v1772_v36, 0.0 }
 0x24e   :  { %218 = vmatpush.msra.mxu2 %v1719_v22 }
 0x255   :  { %1721 = vrot.lane.b32.xlu2 %v1715_v59, %s1967_s28 }
 0x266   :  { %287 = vadd.xlane.f32.xlu0 %v286_v31 }
 0x26e   :  { %506 = vadd.xlane.f32.xlu0 %v505_v34 }
 0x27e   :  { %509 = vadd.xlane.f32.xlu2 %v508_v37 }
 0x282   :  { %1731 = vrot.lane.b32.xlu0 %v1715_v59, %s1968_s0 }
 0x293   :  { %v183_v38 = vpop.xlane.xlu0 %182 }
 0x294   :  { %1773 = vrcp.f32 %v183_v38 }
 0x295   :  { %1775 = vpow2.f32 %v392_v43 }
 0x29a   :  { %v1774_v39 = vpop.eup %1773 }
 0x29b   :  { %v189_v41 = vmul.f32 %v1774_v39, %v1760_v2  ;;  %v1776_v44 = vpop.eup %1775  ;;  %v285_v47 = vpop.xlane.xlu0 %284 }
 0x29c   :  { %v397_v45 = vsel %vm168_vm2, %v1776_v44, 0.0 }
 0x29d   :  { %1610 = vmatmul.msk.f32.vlgmr.msra.gmra.mxu2 %vm168_vm2, %v189_v41 }
 0x2a8   :  { %v396_v0 = vpop.xlane.xlu1 %395 }
 0x2ac   :  { %398 = vadd.xlane.f32.xlu0 %v397_v45 }
 0x2ae   :  { %v1727_v52 = vpop.permute.xlu0 %1726 }
 0x2af   :  { %v1728_v54 = vunpack.i.l.bf16 %v1727_v52  ;;  %v1729_v56 = vunpack.i.h.bf16 %v1727_v52 }
 0x2b0   :  { %v186_v46 = vpop.xlane.xlu2 %185 }
 0x2b1   :  { %1777 = vrcp.f32 %v186_v46 }
 0x2b2   :  { %1779 = vrcp.f32 %v285_v47 }
 0x2b7   :  { %v1778_v49 = vpop.eup %1777 }
 0x2b8   :  { %v1722_v50 = vpop.permute.xlu2 %1721  ;;  %v190_v51 = vmul.f32 %v1778_v49, %v1766_v16  ;;  %v1780_v55 = vpop.eup %1779 }
 0x2b9   :  { %v1723_v53 = vunpack.i.l.bf16 %v1722_v50  ;;  %v1724_v48 = vunpack.i.h.bf16 %v1722_v50  ;;  %v291_v57 = vmul.f32 %v1780_v55, %v2144_v6  ;;  %v1970_v50 = vmov 32.0   ;;  %v662_v55 = vld [vmem:[%s2521_s5 + $0x10] sm:$0xff] }
 0x2ba   :  { %1611 = vmatmul.msk.f32.gmra.mxu2 %vm168_vm2, %v190_v51 }
 0x2bb   :  { %319 = vmatpush.msrb.mxu2 %v1723_v53 }
 0x2bd   :  { %320 = vmatpush.msrb.mxu2 %v1724_v48 }
 0x2bf   :  { %541 = vmatpush.msra.mxu2 %v1728_v54 }
 0x2c1   :  { %542 = vmatpush.msra.mxu2 %v1729_v56  ;;  %v661_v56 = vld [vmem:[%s2521_s5 + $0x8] sm:$0xff] }
 0x2c2   :  { %1616 = vmatmul.msk.f32.vlgmr.msrb.gmra.mxu2 %vm168_vm2, %v291_v57 }
 0x2d9   :  { %v288_v58 = vpop.xlane.xlu0 %287 }
 0x2da   :  { %1781 = vrcp.f32 %v288_v58  ;;  %v660_v58 = vld [vmem:[%s2521_s5] sm:$0xff] }
 0x2e0   :  { %v1782_v59 = vpop.eup %1781 }
 0x2e1   :  { %v507_v60 = vpop.xlane.xlu0 %506  ;;  %v292_v61 = vmul.f32 %v1782_v59, %v1768_v30 }
 0x2e2   :  { %1783 = vrcp.f32 %v507_v60 }
 0x2e3   :  { %1617 = vmatmul.msk.f32.gmra.mxu2 %vm168_vm2, %v292_v61  ;;  %1785 = vrcp.f32 %v396_v0 }
 0x2e8   :  { %v1784_v62 = vpop.eup %1783 }
 0x2e9   :  { %v513_v63 = vmul.f32 %v1784_v62, %v1770_v32  ;;  %v1786_v3 = vpop.eup %1785 }
 0x2ea   :  { %v402_v9 = vmul.f32 %v1786_v3, %v2148_v13 }
 0x2eb   :  { %1628 = vmatmul.msk.f32.vlgmr.msra.gmra.mxu2 %vm168_vm2, %v513_v63 }
 0x2f1   :  { %v510_v1 = vpop.xlane.xlu2 %509 }
 0x2f2   :  { %1787 = vrcp.f32 %v510_v1 }
 0x2f4   :  { %v1732_v2 = vpop.permute.xlu0 %1731 }
 0x2f5   :  { %v1733_v6 = vunpack.i.l.bf16 %v1732_v2  ;;  %v1734_v7 = vunpack.i.h.bf16 %v1732_v2 }
 0x2f7   :  { %430 = vmatpush.msrb.mxu1 %v1733_v6 }
 0x2f8   :  { %v1788_v8 = vpop.eup %1787 }
 0x2f9   :  { %431 = vmatpush.msrb.mxu1 %v1734_v7  ;;  %v514_v10 = vmul.f32 %v1788_v8, %v1772_v36  ;;  %v567_v36 = vperm.slane %v2203_v35, 0 }
 0x2fa   :  { %1622 = vmatmul.msk.f32.vlgmr.msrb.gmra.mxu1 %vm168_vm2, %v402_v9 }
 0x2fb   :  { %1629 = vmatmul.msk.f32.gmra.mxu2 %vm168_vm2, %v514_v10 }
 0x31f   :  { %v399_v11 = vpop.xlane.xlu0 %398 }
 0x320   :  { %1789 = vrcp.f32 %v399_v11  ;;  %v220_v12 = vpop.f32.mrf.mxu2  ;;  %v654_v11 = vperm.slane %v2203_v35, 1 }
 0x321   :  { %226 = vst.msk [vmem:[#allocation2] sm:$0xff] %vm132_vm1, %v220_v12  ;;  %1791 = vrcp.f32 %v1970_v50 }
 0x326   :  { %v1790_v14 = vpop.eup %1789 }
 0x327   :  { %v403_v15 = vmul.f32 %v1790_v14, %v1776_v44  ;;  %v1792_v51 = vpop.eup %1791 }
 0x328   :  { %v606_v52 = vmul.f32 32.0, %v1792_v51  ;;  %vm610_vm6 = vweird.f32 %v1792_v51 }
 0x329   :  { %1623 = vmatmul.msk.f32.gmra.mxu1 %vm168_vm2, %v403_v15  ;;  %v657_v15 = vperm.slane %v2203_v35, 2 }
 0x32a   :  { %v607_v53 = vsub.f32 1.0, %v606_v52 }
 0x32c   :  { %v608_v48 = vmul.f32 %v1792_v51, %v607_v53 }
 0x32e   :  { %v609_v54 = vadd.f32 %v1792_v51, %v608_v48 }
 0x330   :  { %v2226_v57 = vsel %vm610_vm6, %v1792_v51, %v609_v54 }
 0x33d   :  { %v223_v16 = vpop.f32.mrf.mxu2 }
 0x33e   :  { %227 = vst.msk [vmem:[#allocation2 + $0x8] sm:$0xff] %vm132_vm1, %v223_v16 }
 0x345   :  { %v322_v17 = vpop.f32.mrf.mxu2 }
 0x346   :  { %330 = vrot.lane.b32.xlu1 %v322_v17, %s1953_s22 }
 0x366   :  { %v325_v13 = vpop.f32.mrf.mxu2 }
 0x36e   :  { %v544_v18 = vpop.f32.mrf.mxu2 }
 0x36f   :  { %552 = vrot.lane.b32.xlu1 %v544_v18, %s1969_s30 }
 0x377   :  { %v433_v19 = vpop.f32.mrf.mxu1  ;;  %332 = vrot.lane.b32.xlu1 %v325_v13, %s1953_s22 }
 0x378   :  { %441 = vrot.lane.b32.xlu2 %v433_v19, %s2527_s29 }
 0x37e   :  { %v547_v20 = vpop.f32.mrf.mxu2 }
 0x380   :  { %554 = vrot.lane.b32.xlu2 %v547_v20, %s1969_s30 }
 0x3a6   :  { %v436_v21 = vpop.f32.mrf.mxu1 }
 0x3a7   :  { %443 = vrot.lane.b32.xlu0 %v436_v21, %s2527_s29  ;;  %s1593_s29 = sshll.u32 %s2526_s10, 4  ;;  %s1594_s29 = int_to_ptr.hbm [resolvable:$true] %s1593_s29 }
 0x3b8   :  { %v331_v22 = vpop.permute.xlu1 %330 }
 0x3b9   :  { %337 = vst.msk [vmem:[#allocation2] sm:$0xff] %vm336_vm3, %v331_v22 }
 0x3d2   :  { %v442_v28 = vpop.permute.xlu2 %441 }
 0x3d3   :  { %448 = vst.msk [vmem:[#allocation2] sm:$0xff] %vm447_vm4, %v442_v28 }
 0x3da   :  { %v555_v33 = vpop.permute.xlu2 %554 }
 0x3e1   :  { %v553_v29 = vpop.permute.xlu1 %552 }
 0x3e2   :  { %559 = vst.msk [vmem:[#allocation2] sm:$0xff] %vm558_vm5, %v553_v29 }
 0x3e9   :  { %v333_v30 = vpop.permute.xlu1 %332  ;;  %v561_v31 = vld [vmem:[#allocation2] sm:$0xff] }
 0x3ea   :  { %338 = vst.msk [vmem:[#allocation2 + $0x8] sm:$0xff] %vm336_vm3, %v333_v30  ;;  %1630 = vmatmul.msk.f32.vlgmr.msra.gmra.mxu0 %vm96_vm0, %v561_v31 }
 0x419   :  { %v444_v32 = vpop.permute.xlu0 %443 }
 0x41a   :  { %449 = vst.msk [vmem:[#allocation2 + $0x8] sm:$0xff] %vm447_vm4, %v444_v32 }
 0x41b   :  { %560 = vst.msk [vmem:[#allocation2 + $0x8] sm:$0xff] %vm558_vm5, %v555_v33 }
 0x422   :  { %v562_v34 = vld [vmem:[#allocation2 + $0x8] sm:$0xff] }
 0x423   :  { %1631 = vmatmul.msk.f32.gmra.mxu0 %vm96_vm0, %v562_v34 }
 0x467   :  { %v591_v37 = vpop.f32.mrf.mxu0 }
 0x468   :  { %v592_v38 = vadd.f32 %v591_v37, %v567_v36  ;;  %v722_v37 = vld [vmem:[%s2523_s7 + $0x38] sm:$0xff] }
 0x469   :  { %739 = vmatpush.msra.mxu3 %v722_v37 }
 0x46a   :  { %v597_v39 = vadd.f32 %v592_v38, %v2053_v4  ;;  %v721_v38 = vld [vmem:[%s2523_s7 + $0x30] sm:$0xff] }
 0x46b   :  { %740 = vmatpush.msra.mxu3 %v721_v38 }
 0x46c   :  { %v599_v40 = vsel %vm96_vm0, %v597_v39, 0.0  ;;  %v614_v41 = vmul.f32 %v597_v39, %v597_v39 }
 0x46d   :  { %600 = vadd.xlane.f32.xlu1 %v599_v40  ;;  %v719_v40 = vld [vmem:[%s2523_s7 + $0x20] sm:$0xff] }
 0x46e   :  { %v616_v43 = vsel %vm96_vm0, %v614_v41, 0.0  ;;  %v718_v41 = vld [vmem:[%s2523_s7 + $0x18] sm:$0xff] }
 0x46f   :  { %617 = vadd.xlane.f32.xlu2 %v616_v43  ;;  %v717_v43 = vld [vmem:[%s2523_s7 + $0x10] sm:$0xff] }
 0x4a0   :  { %v594_v44 = vpop.f32.mrf.mxu0 }
 0x4a1   :  { %v595_v45 = vadd.f32 %v594_v44, %v567_v36  ;;  %v716_v44 = vld [vmem:[%s2523_s7 + $0x8] sm:$0xff] }
 0x4a3   :  { %v2210_v46 = vadd.f32 %v595_v45, %v2057_v5  ;;  %v663_v5 = vld [vmem:[%s2521_s5 + $0x18] sm:$0xff]  ;;  %v715_v45 = vld [vmem:[%s2523_s7] sm:$0xff] }
 0x4a4   :  { %686 = vmatpush.msra.mxu1 %v663_v5 }
 0x4a5   :  { %v602_v47 = vsel %vm96_vm0, %v2210_v46, 0.0  ;;  %v615_v49 = vmul.f32 %v2210_v46, %v2210_v46 }
 0x4a6   :  { %603 = vadd.xlane.f32.xlu0 %v602_v47  ;;  %687 = vmatpush.msra.mxu1 %v662_v55 }
 0x4a7   :  { %v619_v4 = vsel %vm96_vm0, %v615_v49, 0.0 }
 0x4a8   :  { %620 = vadd.xlane.f32.xlu1 %v619_v4  ;;  %688 = vmatpush.msra.mxu1 %v661_v56 }
 0x4aa   :  { %689 = vmatpush.msra.mxu1 %v660_v58 }
 0x4e0   :  { %v601_v59 = vpop.xlane.xlu1 %600 }
 0x4e1   :  { %v612_v60 = vmul.f32 %v2226_v57, %v601_v59 }
 0x4e2   :  { %v618_v61 = vpop.xlane.xlu2 %617 }
 0x4e3   :  { %v624_v62 = vmul.f32 %v612_v60, %v612_v60  ;;  %v622_v63 = vmul.f32 %v618_v61, %v2226_v57  ;;  %v628_v10 = vsub.f32 %v597_v39, %v612_v60  ;;  %v720_v39 = vld [vmem:[%s2523_s7 + $0x28] sm:$0xff] }
 0x4e4   :  { %741 = vmatpush.msra.mxu3 %v720_v39  ;;  %v804_v39 = vperm.slane %v2203_v35, 4 }
 0x4e5   :  { %v626_v0 = vsub.f32 %v622_v63, %v624_v62 }
 0x4e6   :  { %742 = vmatpush.msra.mxu3 %v719_v40 }
 0x4e7   :  { %v630_v1 = vadd.f32 1e-05, %v626_v0 }
 0x4e8   :  { %743 = vmatpush.msra.mxu3 %v718_v41 }
 0x4e9   :  { %1793 = vrsqrt.f32 %v630_v1  ;;  %vm638_vm8 = vweird.f32 %v630_v1 }
 0x4ea   :  { %744 = vmatpush.msra.mxu3 %v717_v43  ;;  %v807_v43 = vperm.slane %v2203_v35, 5 }
 0x4ec   :  { %745 = vmatpush.msra.mxu3 %v716_v44 }
 0x4ee   :  { %746 = vmatpush.msra.mxu3 %v715_v45 }
 0x4ef   :  { %v1794_v2 = vpop.eup %1793 }
 0x4f0   :  { %v633_v3 = vmul.f32 %v1794_v2, %v630_v1  ;;  %vm639_vm7 = vweird.f32 %v1794_v2 }
 0x4f1   :  { %vm640_vm9 = vmor %vm638_vm8, %vm639_vm7 }
 0x4f2   :  { %v634_v6 = vmul.f32 %v1794_v2, %v633_v3 }
 0x4f4   :  { %v635_v7 = vmul.f32 0.5, %v634_v6  ;;  %v723_v6 = vperm.slane %v2203_v35, 3 }
 0x4f6   :  { %v636_v8 = vsub.f32 1.5, %v635_v7 }
 0x4f8   :  { %v637_v9 = vmul.f32 %v1794_v2, %v636_v8 }
 0x4fa   :  { %v641_v12 = vsel %vm640_vm9, %v1794_v2, %v637_v9 }
 0x4fb   :  { %v652_v14 = vmul.f32 %v641_v12, %v628_v10 }
 0x4fd   :  { %v655_v16 = vmul.f32 %v654_v11, %v652_v14 }
 0x4ff   :  { %v2235_v17 = vadd.f32 %v657_v15, %v655_v16 }
 0x501   :  { %1632 = vmatmul.msk.f32.vlgmr.msra.gmra.mxu1 %vm96_vm0, %v2235_v17 }
 0x519   :  { %v604_v13 = vpop.xlane.xlu0 %603 }
 0x51a   :  { %v613_v18 = vmul.f32 %v2226_v57, %v604_v13 }
 0x51b   :  { %v621_v19 = vpop.xlane.xlu1 %620 }
 0x51c   :  { %v625_v20 = vmul.f32 %v613_v18, %v613_v18  ;;  %v623_v21 = vmul.f32 %v621_v19, %v2226_v57  ;;  %v629_v31 = vsub.f32 %v2210_v46, %v613_v18  ;;  %v1756_v46 = vld [vmem:[#allocation8] ss:$0 sm:$0xff] }
 0x51e   :  { %v627_v22 = vsub.f32 %v623_v21, %v625_v20  ;;  %v1639_v20 = vld [vmem:[%s2518_s2 + $0x30] sm:$0xff]  ;;  %v1638_v21 = vld [vmem:[%s2518_s2 + $0x28] sm:$0xff] }
 0x520   :  { %v631_v23 = vadd.f32 1e-05, %v627_v22  ;;  %v1637_v22 = vld [vmem:[%s2518_s2 + $0x20] sm:$0xff] }
 0x522   :  { %1795 = vrsqrt.f32 %v631_v23  ;;  %vm648_vm11 = vweird.f32 %v631_v23 }
 0x528   :  { %v1796_v24 = vpop.eup %1795 }
 0x529   :  { %v643_v25 = vmul.f32 %v1796_v24, %v631_v23  ;;  %vm649_vm10 = vweird.f32 %v1796_v24 }
 0x52a   :  { %vm650_vm12 = vmor %vm648_vm11, %vm649_vm10 }
 0x52b   :  { %v644_v27 = vmul.f32 %v1796_v24, %v643_v25 }
 0x52d   :  { %v645_v28 = vmul.f32 0.5, %v644_v27 }
 0x52f   :  { %v646_v29 = vsub.f32 1.5, %v645_v28 }
 0x531   :  { %v647_v30 = vmul.f32 %v1796_v24, %v646_v29 }
 0x533   :  { %v651_v32 = vsel %vm650_vm12, %v1796_v24, %v647_v30 }
 0x534   :  { %v653_v33 = vmul.f32 %v651_v32, %v629_v31 }
 0x536   :  { %v656_v34 = vmul.f32 %v654_v11, %v653_v33 }
 0x538   :  { %v659_v36 = vadd.f32 %v657_v15, %v656_v34 }
 0x53a   :  { %1633 = vmatmul.msk.f32.gmra.mxu1 %vm96_vm0, %v659_v36 }
 0x57e   :  { %v691_v47 = vpop.f32.mrf.mxu1 }
 0x57f   :  { %v692_v49 = vadd.f32 %v1756_v46, %v691_v47 }
 0x581   :  { %v697_v4 = vmul.f32 %v692_v49, %v692_v49 }
 0x583   :  { %v699_v50 = vmul.f32 %v697_v4, %v692_v49 }
 0x585   :  { %v701_v51 = vmul.f32 0.044715, %v699_v50 }
 0x587   :  { %v703_v52 = vadd.f32 %v701_v51, %v692_v49 }
 0x589   :  { %v705_v53 = vmul.f32 0.7978846, %v703_v52 }
 0x58b   :  { %1797 = vtanh.f32 %v705_v53 }
 0x591   :  { %v1798_v48 = vpop.eup %1797 }
 0x592   :  { %v709_v54 = vadd.f32 1.0, %v1798_v48 }
 0x594   :  { %v711_v5 = vmul.f32 0.5, %v709_v54 }
 0x596   :  { %v713_v55 = vmul.f32 %v711_v5, %v692_v49 }
 0x598   :  { %1634 = vmatmul.msk.f32.vlgmr.msra.gmra.mxu3 %vm724_vm13, %v713_v55 }
 0x5b7   :  { %v694_v56 = vpop.f32.mrf.mxu1 }
 0x5b8   :  { %v695_v58 = vadd.f32 %v1756_v46, %v694_v56 }
 0x5ba   :  { %v698_v59 = vmul.f32 %v695_v58, %v695_v58 }
 0x5bc   :  { %v700_v60 = vmul.f32 %v698_v59, %v695_v58 }
 0x5be   :  { %v702_v61 = vmul.f32 0.044715, %v700_v60 }
 0x5c0   :  { %v704_v62 = vadd.f32 %v702_v61, %v695_v58 }
 0x5c2   :  { %v706_v63 = vmul.f32 0.7978846, %v704_v62  ;;  %v1757_v62 = vld [vmem:[%s2519_s3 + $0x1] ss:$0 sm:$0xff]  ;;  %s2529_s3 = smov 16  }
 0x5c4   :  { %1799 = vtanh.f32 %v706_v63 }
 0x5ca   :  { %v1800_v0 = vpop.eup %1799 }
 0x5cb   :  { %v710_v1 = vadd.f32 1.0, %v1800_v0 }
 0x5cd   :  { %v712_v2 = vmul.f32 0.5, %v710_v1 }
 0x5cf   :  { %v714_v3 = vmul.f32 %v712_v2, %v695_v58 }
 0x5d1   :  { %1635 = vmatmul.msk.f32.gmra.mxu3 %vm724_vm13, %v714_v3 }
 0x61b   :  { %v748_v7 = vpop.f32.mrf.mxu3 }
 0x61c   :  { %v749_v8 = vadd.f32 %v748_v7, %v723_v6 }
 0x61e   :  { %v754_v9 = vadd.f32 %v749_v8, %v2235_v17  ;;  %v1640_v17 = vld [vmem:[%s2518_s2 + $0x38] sm:$0xff] }
 0x61f   :  { %840 = vmatpush.msrb.mxu2 %v1640_v17 }
 0x620   :  { %v756_v10 = vsel %vm96_vm0, %v754_v9, 0.0  ;;  %v764_v11 = vmul.f32 %v754_v9, %v754_v9 }
 0x621   :  { %757 = vadd.xlane.f32.xlu2 %v756_v10  ;;  %841 = vmatpush.msrb.mxu2 %v1639_v20 }
 0x622   :  { %v766_v12 = vsel %vm96_vm0, %v764_v11, 0.0 }
 0x623   :  { %767 = vadd.xlane.f32.xlu1 %v766_v12  ;;  %842 = vmatpush.msrb.mxu2 %v1638_v21 }
 0x625   :  { %843 = vmatpush.msrb.mxu2 %v1637_v22 }
 0x654   :  { %v751_v14 = vpop.f32.mrf.mxu3 }
 0x655   :  { %v752_v15 = vadd.f32 %v751_v14, %v723_v6 }
 0x657   :  { %v755_v16 = vadd.f32 %v752_v15, %v659_v36 }
 0x659   :  { %v759_v13 = vsel %vm96_vm0, %v755_v16, 0.0  ;;  %v765_v18 = vmul.f32 %v755_v16, %v755_v16 }
 0x65a   :  { %760 = vadd.xlane.f32.xlu2 %v759_v13 }
 0x65b   :  { %v769_v19 = vsel %vm96_vm0, %v765_v18, 0.0 }
 0x65c   :  { %770 = vadd.xlane.f32.xlu0 %v769_v19 }
 0x694   :  { %v758_v23 = vpop.xlane.xlu2 %757 }
 0x695   :  { %v762_v24 = vmul.f32 %v758_v23, %v2226_v57 }
 0x696   :  { %v768_v25 = vpop.xlane.xlu1 %767 }
 0x697   :  { %v774_v27 = vmul.f32 %v762_v24, %v762_v24  ;;  %v772_v28 = vmul.f32 %v768_v25, %v2226_v57  ;;  %v778_v38 = vsub.f32 %v754_v9, %v762_v24 }
 0x699   :  { %v776_v29 = vsub.f32 %v772_v28, %v774_v27 }
 0x69b   :  { %v780_v30 = vadd.f32 1e-05, %v776_v29 }
 0x69d   :  { %1801 = vrsqrt.f32 %v780_v30  ;;  %vm788_vm15 = vweird.f32 %v780_v30 }
 0x6a3   :  { %v1802_v31 = vpop.eup %1801 }
 0x6a4   :  { %v783_v32 = vmul.f32 %v1802_v31, %v780_v30  ;;  %vm789_vm14 = vweird.f32 %v1802_v31 }
 0x6a5   :  { %vm790_vm6 = vmor %vm788_vm15, %vm789_vm14 }
 0x6a6   :  { %v784_v33 = vmul.f32 %v1802_v31, %v783_v32 }
 0x6a8   :  { %v785_v34 = vmul.f32 0.5, %v784_v33 }
 0x6aa   :  { %v786_v36 = vsub.f32 1.5, %v785_v34 }
 0x6ac   :  { %v787_v37 = vmul.f32 %v1802_v31, %v786_v36 }
 0x6ae   :  { %v791_v40 = vsel %vm790_vm6, %v1802_v31, %v787_v37 }
 0x6af   :  { %v802_v41 = vmul.f32 %v791_v40, %v778_v38 }
 0x6b1   :  { %v805_v44 = vmul.f32 %v804_v39, %v802_v41 }
 0x6b3   :  { %v2291_v45 = vadd.f32 %v807_v43, %v805_v44 }
 0x6b5   :  { %1642 = vmatmul.msk.f32.vlgmr.msrb.gmra.mxu2 %vm96_vm0, %v2291_v45 }
 0x6cd   :  { %v761_v46 = vpop.xlane.xlu2 %760 }
 0x6ce   :  { %v763_v47 = vmul.f32 %v761_v46, %v2226_v57 }
 0x6cf   :  { %v771_v49 = vpop.xlane.xlu0 %770 }
 0x6d0   :  { %v775_v4 = vmul.f32 %v763_v47, %v763_v47  ;;  %v773_v50 = vmul.f32 %v771_v49, %v2226_v57  ;;  %v779_v56 = vsub.f32 %v755_v16, %v763_v47 }
 0x6d2   :  { %v777_v51 = vsub.f32 %v773_v50, %v775_v4 }
 0x6d4   :  { %v781_v52 = vadd.f32 1e-05, %v777_v51 }
 0x6d6   :  { %1803 = vrsqrt.f32 %v781_v52  ;;  %vm798_vm8 = vweird.f32 %v781_v52 }
 0x6dc   :  { %v1804_v53 = vpop.eup %1803 }
 0x6dd   :  { %v793_v48 = vmul.f32 %v1804_v53, %v781_v52  ;;  %vm799_vm7 = vweird.f32 %v1804_v53 }
 0x6de   :  { %vm800_vm9 = vmor %vm798_vm8, %vm799_vm7 }
 0x6df   :  { %v794_v54 = vmul.f32 %v1804_v53, %v793_v48 }
 0x6e1   :  { %v795_v35 = vmul.f32 0.5, %v794_v54 }
 0x6e3   :  { %v796_v5 = vsub.f32 1.5, %v795_v35 }
 0x6e5   :  { %v797_v55 = vmul.f32 %v1804_v53, %v796_v5 }
 0x6e7   :  { %v801_v58 = vsel %vm800_vm9, %v1804_v53, %v797_v55  ;;  %vm1584_vm9 = vcmask 123904  }
 0x6e8   :  { %v803_v59 = vmul.f32 %v801_v58, %v779_v56 }
 0x6ea   :  { %v806_v60 = vmul.f32 %v804_v39, %v803_v59 }
 0x6ec   :  { %v2297_v61 = vadd.f32 %v807_v43, %v806_v60 }
 0x6ee   :  { %1643 = vmatmul.msk.f32.gmra.mxu2 %vm96_vm0, %v2297_v61 }
 0x738   :  { %v845_v63 = vpop.f32.mrf.mxu2 }
 0x739   :  { %v846_v0 = vadd.f32 %v1757_v62, %v845_v63 }
 0x73b   :  { %951 = vrot.lane.b32.xlu0 %v846_v0, %s1958_s19  ;;  %955 = vrot.lane.b32.xlu2 %v846_v0, %s1959_s20 }
 0x743   :  { %853 = vrot.lane.b32.xlu0 %v846_v0, %s1960_s21 }
 0x74b   :  { %1175 = vrot.lane.b32.xlu0 %v846_v0, %s1962_s24 }
 0x753   :  { %1065 = vrot.lane.b32.xlu0 %v846_v0, %s1963_s25 }
 0x771   :  { %v848_v1 = vpop.f32.mrf.mxu2 }
 0x772   :  { %v849_v2 = vadd.f32 %v1757_v62, %v848_v1 }
 0x774   :  { %1063 = vrot.lane.b32.xlu0 %v849_v2, %s1964_s26  ;;  %953 = vrot.lane.b32.xlu2 %v849_v2, %s1958_s19  ;;  %v2318_v3 = vpack.i.bf16 %v846_v0, %v849_v2 }
 0x775   :  { %957 = vrot.lane.b32.xlu1 %v849_v2, %s1959_s20 }
 0x77c   :  { %1171 = vrot.lane.b32.xlu2 %v846_v0, %s1961_s23 }
 0x77d   :  { %855 = vrot.lane.b32.xlu1 %v849_v2, %s1960_s21 }
 0x784   :  { %1173 = vrot.lane.b32.xlu2 %v849_v2, %s1961_s23 }
 0x785   :  { %1177 = vrot.lane.b32.xlu1 %v849_v2, %s1962_s24 }
 0x78d   :  { %1067 = vrot.lane.b32.xlu1 %v849_v2, %s1963_s25 }
 0x795   :  { %1061 = vrot.lane.b32.xlu1 %v846_v0, %s1964_s26  ;;  %v956_v8 = vpop.permute.xlu2 %955 }
 0x79d   :  { %1736 = vrot.lane.b32.xlu1 %v2318_v3, %s1967_s28 }
 0x7ad   :  { %v952_v6 = vpop.permute.xlu0 %951 }
 0x7b5   :  { %v854_v9 = vpop.permute.xlu0 %853 }
 0x7bd   :  { %v1176_v14 = vpop.permute.xlu0 %1175 }
 0x7c5   :  { %v1066_v13 = vpop.permute.xlu0 %1065 }
 0x7ce   :  { %v954_v11 = vpop.permute.xlu2 %953 }
 0x7d6   :  { %v1172_v15 = vpop.permute.xlu2 %1171 }
 0x7de   :  { %v1174_v18 = vpop.permute.xlu2 %1173 }
 0x7e6   :  { %v1064_v17 = vpop.permute.xlu0 %1063 }
 0x7e7   :  { %v958_v7 = vpop.permute.xlu1 %957 }
 0x7e8   :  { %1650 = vmatpush.xpose.msk.msrb.mxu3 %vm132_vm1, %v958_v7 }
 0x7ec   :  { %1651 = vmatpush.xpose.msk.msrb.mxu3 %vm132_vm1, %v956_v8 }
 0x7ef   :  { %v856_v10 = vpop.permute.xlu1 %855  ;;  %1652 = vmatmul.msk.f32.vlgmr.msrb.gmra.mxu3 %vm132_vm1, %v952_v6 }
 0x7f0   :  { %1644 = vmatpush.xpose.msk.msrb.mxu0 %vm132_vm1, %v856_v10 }
 0x7f4   :  { %1645 = vmatpush.xpose.msk.msrb.mxu0 %vm132_vm1, %v854_v9 }
 0x7f7   :  { %1646 = vmatmul.msk.f32.vlgmr.msrb.gmra.mxu0 %vm132_vm1, %v846_v0  ;;  %v1178_v12 = vpop.permute.xlu1 %1177  ;;  %1653 = vmatmul.msk.f32.gmra.mxu3 %vm132_vm1, %v954_v11 }
 0x7f8   :  { %1662 = vmatpush.xpose.msk.msra.mxu3 %vm132_vm1, %v1178_v12 }
 0x7fc   :  { %1663 = vmatpush.xpose.msk.msra.mxu3 %vm132_vm1, %v1176_v14 }
 0x7ff   :  { %1647 = vmatmul.msk.f32.gmra.mxu0 %vm132_vm1, %v849_v2  ;;  %v1068_v16 = vpop.permute.xlu1 %1067  ;;  %1664 = vmatmul.msk.f32.vlgmr.msra.gmra.mxu3 %vm132_vm1, %v1172_v15 }
 0x800   :  { %1656 = vmatpush.xpose.msk.msra.mxu0 %vm132_vm1, %v1068_v16 }
 0x804   :  { %1657 = vmatpush.xpose.msk.msra.mxu0 %vm132_vm1, %v1066_v13 }
 0x807   :  { %v1062_v19 = vpop.permute.xlu1 %1061  ;;  %1665 = vmatmul.msk.f32.gmra.mxu3 %vm132_vm1, %v1174_v18 }
 0x808   :  { %1658 = vmatmul.msk.f32.vlgmr.msra.gmra.mxu0 %vm132_vm1, %v1062_v19 }
 0x80f   :  { %v1737_v20 = vpop.permute.xlu1 %1736 }
 0x810   :  { %v1738_v21 = vunpack.i.l.bf16 %v1737_v20  ;;  %1659 = vmatmul.msk.f32.gmra.mxu0 %vm132_vm1, %v1064_v17  ;;  %v1739_v22 = vunpack.i.h.bf16 %v1737_v20 }
 0x812   :  { %1042 = vmatpush.msra.mxu2 %v1738_v21 }
 0x814   :  { %1043 = vmatpush.msra.mxu2 %v1739_v22 }
 0x872   :  { %v984_v23 = vpop.f32.mrf.mxu3 }
 0x873   :  { %v990_v24 = vmul.f32 0.35355338, %v984_v23 }
 0x874   :  { %v882_v25 = vpop.f32.mrf.mxu0 }
 0x875   :  { %v888_v27 = vmul.f32 0.35355338, %v882_v25  ;;  %v992_v28 = vadd.f32 %v990_v24, %v2114_v26 }
 0x877   :  { %v994_v29 = vsel %vm168_vm2, %v992_v28, -inf  ;;  %v890_v30 = vadd.f32 %v888_v27, %v2114_v26 }
 0x878   :  { %995 = vmax.xlane.f32.xlu2 %v994_v29 }
 0x879   :  { %v892_v31 = vsel %vm168_vm2, %v890_v30, -inf }
 0x87a   :  { %893 = vmax.xlane.f32.xlu1 %v892_v31  ;;  %v987_v32 = vpop.f32.mrf.mxu3 }
 0x87b   :  { %v991_v33 = vmul.f32 0.35355338, %v987_v32 }
 0x87c   :  { %v885_v34 = vpop.f32.mrf.mxu0 }
 0x87d   :  { %v889_v36 = vmul.f32 0.35355338, %v885_v34  ;;  %v993_v37 = vadd.f32 %v991_v33, %v2122_v42 }
 0x87f   :  { %v997_v38 = vsel %vm168_vm2, %v993_v37, -inf  ;;  %v891_v39 = vadd.f32 %v889_v36, %v2122_v42 }
 0x880   :  { %998 = vmax.xlane.f32.xlu0 %v997_v38 }
 0x881   :  { %v895_v40 = vsel %vm168_vm2, %v891_v39, -inf }
 0x882   :  { %896 = vmax.xlane.f32.xlu2 %v895_v40  ;;  %v1204_v41 = vpop.f32.mrf.mxu3 }
 0x883   :  { %v1210_v43 = vmul.f32 0.35355338, %v1204_v41 }
 0x885   :  { %v1094_v44 = vpop.f32.mrf.mxu0  ;;  %v1212_v46 = vadd.f32 %v1210_v43, %v2114_v26 }
 0x886   :  { %v1100_v47 = vmul.f32 0.35355338, %v1094_v44 }
 0x887   :  { %v1214_v49 = vsel %vm168_vm2, %v1212_v46, -inf }
 0x888   :  { %1215 = vmax.xlane.f32.xlu1 %v1214_v49  ;;  %v1102_v4 = vadd.f32 %v1100_v47, %v2114_v26 }
 0x88a   :  { %v1207_v50 = vpop.f32.mrf.mxu3  ;;  %v1104_v51 = vsel %vm168_vm2, %v1102_v4, -inf }
 0x88b   :  { %v1211_v52 = vmul.f32 0.35355338, %v1207_v50  ;;  %1105 = vmax.xlane.f32.xlu0 %v1104_v51 }
 0x88d   :  { %v1097_v53 = vpop.f32.mrf.mxu0  ;;  %v2351_v48 = vadd.f32 %v1211_v52, %v2122_v42 }
 0x88e   :  { %v1101_v54 = vmul.f32 0.35355338, %v1097_v53 }
 0x88f   :  { %v1217_v35 = vsel %vm168_vm2, %v2351_v48, -inf }
 0x890   :  { %1218 = vmax.xlane.f32.xlu2 %v1217_v35  ;;  %v1103_v5 = vadd.f32 %v1101_v54, %v2122_v42 }
 0x892   :  { %v1107_v55 = vsel %vm168_vm2, %v1103_v5, -inf }
 0x893   :  { %1108 = vmax.xlane.f32.xlu1 %v1107_v55 }
 0x8ac   :  { %1746 = vrot.lane.b32.xlu1 %v2318_v3, %s1966_s1 }
 0x8eb   :  { %v996_v26 = vpop.xlane.xlu2 %995 }
 0x8ec   :  { %v1000_v56 = vsub.f32 %v992_v28, %v996_v26 }
 0x8ed   :  { %v894_v58 = vpop.xlane.xlu1 %893 }
 0x8ee   :  { %v1002_v59 = vmul.f32 1.442695, %v1000_v56  ;;  %v898_v60 = vsub.f32 %v890_v30, %v894_v58 }
 0x8f0   :  { %1805 = vpow2.f32 %v1002_v59  ;;  %v900_v62 = vmul.f32 1.442695, %v898_v60 }
 0x8f2   :  { %1807 = vpow2.f32 %v900_v62 }
 0x8f3   :  { %v999_v63 = vpop.xlane.xlu0 %998 }
 0x8f4   :  { %v1001_v7 = vsub.f32 %v993_v37, %v999_v63 }
 0x8f5   :  { %v897_v0 = vpop.xlane.xlu2 %896 }
 0x8f6   :  { %v1806_v1 = vpop.eup %1805  ;;  %v899_v2 = vsub.f32 %v891_v39, %v897_v0  ;;  %v1004_v10 = vmul.f32 1.442695, %v1001_v7 }
 0x8f7   :  { %v1006_v42 = vsel %vm168_vm2, %v1806_v1, 0.0 }
 0x8f8   :  { %v2360_v6 = vpop.eup %1807  ;;  %v902_v8 = vmul.f32 1.442695, %v899_v2  ;;  %1007 = vadd.xlane.f32.xlu0 %v1006_v42 }
 0x8f9   :  { %v904_v9 = vsel %vm168_vm2, %v2360_v6, 0.0 }
 0x8fa   :  { %1809 = vpow2.f32 %v902_v8  ;;  %905 = vadd.xlane.f32.xlu2 %v904_v9 }
 0x8fb   :  { %v1216_v11 = vpop.xlane.xlu1 %1215  ;;  %1811 = vpow2.f32 %v1004_v10 }
 0x8fc   :  { %v1220_v20 = vsub.f32 %v1212_v46, %v1216_v11 }
 0x8fe   :  { %v1106_v12 = vpop.xlane.xlu0 %1105  ;;  %v1222_v23 = vmul.f32 1.442695, %v1220_v20 }
 0x8ff   :  { %v1110_v15 = vsub.f32 %v1102_v4, %v1106_v12 }
 0x900   :  { %v1810_v14 = vpop.eup %1809 }
 0x901   :  { %v907_v16 = vsel %vm168_vm2, %v1810_v14, 0.0  ;;  %v1112_v13 = vmul.f32 1.442695, %v1110_v15  ;;  %v1812_v18 = vpop.eup %1811 }
 0x902   :  { %908 = vadd.xlane.f32.xlu0 %v907_v16  ;;  %v1009_v22 = vsel %vm168_vm2, %v1812_v18, 0.0 }
 0x903   :  { %1813 = vpow2.f32 %v1112_v13  ;;  %v1219_v34 = vpop.xlane.xlu2 %1218  ;;  %v1671_v13 = vld [vmem:[%s2520_s4 + $0x38] sm:$0xff] }
 0x904   :  { %v1221_v36 = vsub.f32 %v2351_v48, %v1219_v34  ;;  %1307 = vmatpush.msrb.mxu0 %v1671_v13 }
 0x906   :  { %v1109_v19 = vpop.xlane.xlu1 %1108  ;;  %v1224_v37 = vmul.f32 1.442695, %v1221_v36 }
 0x907   :  { %v1111_v17 = vsub.f32 %v1103_v5, %v1109_v19  ;;  %v1669_v19 = vld [vmem:[%s2520_s4 + $0x28] sm:$0xff] }
 0x909   :  { %v1114_v21 = vmul.f32 1.442695, %v1111_v17  ;;  %v2366_v24 = vpop.eup %1813  ;;  %v1668_v17 = vld [vmem:[%s2520_s4 + $0x20] sm:$0xff] }
 0x90a   :  { %1010 = vadd.xlane.f32.xlu0 %v1009_v22  ;;  %v1116_v27 = vsel %vm168_vm2, %v2366_v24, 0.0 }
 0x90b   :  { %1815 = vpow2.f32 %v1114_v21 }
 0x90c   :  { %1817 = vpow2.f32 %v1222_v23 }
 0x90d   :  { %1819 = vpow2.f32 %v1224_v37 }
 0x911   :  { %v2368_v25 = vpop.eup %1815 }
 0x912   :  { %1741 = vrot.lane.b32.xlu2 %v2318_v3, %s1965_s27  ;;  %1117 = vadd.xlane.f32.xlu0 %v1116_v27  ;;  %v1119_v28 = vsel %vm168_vm2, %v2368_v25, 0.0  ;;  %v1818_v29 = vpop.eup %1817 }
 0x913   :  { %1120 = vadd.xlane.f32.xlu1 %v1119_v28  ;;  %v1226_v30 = vsel %vm168_vm2, %v1818_v29, 0.0  ;;  %v1820_v38 = vpop.eup %1819  ;;  %v2423_v28 = vld [vmem:[%s2524_s8 + $0x8] sm:$0x3f] }
 0x914   :  { %v1229_v39 = vsel %vm168_vm2, %v1820_v38, 0.0 }
 0x91a   :  { %1227 = vadd.xlane.f32.xlu0 %v1226_v30 }
 0x91e   :  { %v1747_v31 = vpop.permute.xlu1 %1746 }
 0x91f   :  { %v1748_v32 = vunpack.i.l.bf16 %v1747_v31  ;;  %v1749_v33 = vunpack.i.h.bf16 %v1747_v31 }
 0x921   :  { %1262 = vmatpush.msrb.mxu2 %v1748_v32 }
 0x923   :  { %1263 = vmatpush.msrb.mxu2 %v1749_v33 }
 0x92e   :  { %1751 = vrot.lane.b32.xlu0 %v2318_v3, %s1968_s0 }
 0x93b   :  { %1230 = vadd.xlane.f32.xlu2 %v1229_v39 }
 0x96b   :  { %v1008_v40 = vpop.xlane.xlu0 %1007 }
 0x96c   :  { %1821 = vrcp.f32 %v1008_v40 }
 0x96d   :  { %v906_v41 = vpop.xlane.xlu2 %905 }
 0x96e   :  { %1823 = vrcp.f32 %v906_v41 }
 0x972   :  { %v1822_v43 = vpop.eup %1821 }
 0x973   :  { %v1014_v44 = vmul.f32 %v1822_v43, %v1806_v1 }
 0x974   :  { %v1824_v49 = vpop.eup %1823 }
 0x975   :  { %1654 = vmatmul.msk.f32.vlgmr.msra.gmra.mxu2 %vm168_vm2, %v1014_v44  ;;  %v909_v46 = vpop.xlane.xlu0 %908  ;;  %v1742_v47 = vpop.permute.xlu2 %1741  ;;  %v912_v3 = vmul.f32 %v1824_v49, %v2360_v6  ;;  %v1676_v44 = vld [vmem:[%s2521_s5 + $0x30] sm:$0xff] }
 0x976   :  { %v1743_v4 = vunpack.i.l.bf16 %v1742_v47  ;;  %1825 = vrcp.f32 %v909_v46  ;;  %v1744_v50 = vunpack.i.h.bf16 %v1742_v47  ;;  %v1674_v46 = vld [vmem:[%s2521_s5 + $0x20] sm:$0xff] }
 0x978   :  { %940 = vmatpush.msrb.mxu1 %v1743_v4 }
 0x97a   :  { %941 = vmatpush.msrb.mxu1 %v1744_v50 }
 0x97b   :  { %1648 = vmatmul.msk.f32.vlgmr.msrb.gmra.mxu1 %vm168_vm2, %v912_v3 }
 0x97c   :  { %v1826_v52 = vpop.eup %1825 }
 0x97d   :  { %v1011_v51 = vpop.xlane.xlu0 %1010  ;;  %v913_v53 = vmul.f32 %v1826_v52, %v1810_v14 }
 0x97e   :  { %1827 = vrcp.f32 %v1011_v51 }
 0x983   :  { %1649 = vmatmul.msk.f32.gmra.mxu1 %vm168_vm2, %v913_v53 }
 0x984   :  { %v1828_v48 = vpop.eup %1827 }
 0x985   :  { %v1118_v54 = vpop.xlane.xlu0 %1117  ;;  %v1015_v35 = vmul.f32 %v1828_v48, %v1812_v18  ;;  %v1670_v18 = vld [vmem:[%s2520_s4 + $0x30] sm:$0xff] }
 0x986   :  { %v1121_v56 = vpop.xlane.xlu1 %1120  ;;  %1308 = vmatpush.msrb.mxu0 %v1670_v18 }
 0x987   :  { %1655 = vmatmul.msk.f32.gmra.mxu2 %vm168_vm2, %v1015_v35 }
 0x988   :  { %1309 = vmatpush.msrb.mxu0 %v1669_v19 }
 0x98a   :  { %1310 = vmatpush.msrb.mxu0 %v1668_v17 }
 0x98d   :  { %v1228_v5 = vpop.xlane.xlu0 %1227 }
 0x98e   :  { %1829 = vrcp.f32 %v1228_v5 }
 0x98f   :  { %1831 = vrcp.f32 %v1118_v54 }
 0x990   :  { %1833 = vrcp.f32 %v1121_v56 }
 0x994   :  { %v1830_v55 = vpop.eup %1829 }
 0x995   :  { %v1234_v26 = vmul.f32 %v1830_v55, %v1818_v29  ;;  %v1832_v59 = vpop.eup %1831  ;;  %v1288_v29 = vperm.slane %v2423_v28, 0 }
 0x996   :  { %v1124_v63 = vmul.f32 %v1832_v59, %v2366_v24  ;;  %v1834_v0 = vpop.eup %1833  ;;  %v1368_v59 = vperm.slane %v2423_v28, 1 }
 0x997   :  { %1666 = vmatmul.msk.f32.vlgmr.msrb.gmra.mxu2 %vm168_vm2, %v1234_v26  ;;  %v1125_v1 = vmul.f32 %v1834_v0, %v2368_v25 }
 0x9a0   :  { %v1752_v58 = vpop.permute.xlu0 %1751 }
 0x9a1   :  { %v1753_v60 = vunpack.i.l.bf16 %v1752_v58  ;;  %v1754_v62 = vunpack.i.h.bf16 %v1752_v58 }
 0x9a3   :  { %1152 = vmatpush.msra.mxu1 %v1753_v60 }
 0x9a5   :  { %1153 = vmatpush.msra.mxu1 %v1754_v62 }
 0x9a6   :  { %1660 = vmatmul.msk.f32.vlgmr.msra.gmra.mxu1 %vm168_vm2, %v1124_v63 }
 0x9ae   :  { %v1231_v2 = vpop.xlane.xlu2 %1230  ;;  %1661 = vmatmul.msk.f32.gmra.mxu1 %vm168_vm2, %v1125_v1 }
 0x9af   :  { %1835 = vrcp.f32 %v1231_v2  ;;  %v1371_v2 = vperm.slane %v2423_v28, 2 }
 0x9b5   :  { %v1836_v42 = vpop.eup %1835 }
 0x9b6   :  { %v1235_v6 = vmul.f32 %v1836_v42, %v1820_v38 }
 0x9b8   :  { %1667 = vmatmul.msk.f32.gmra.mxu2 %vm168_vm2, %v1235_v6 }
 0x9f8   :  { %v943_v7 = vpop.f32.mrf.mxu1  ;;  %v1045_v8 = vpop.f32.mrf.mxu2 }
 0x9f9   :  { %949 = vst.msk [vmem:[#allocation2] sm:$0xff] %vm132_vm1, %v943_v7  ;;  %1053 = vrot.lane.b32.xlu0 %v1045_v8, %s1953_s22 }
 0xa00   :  { %v946_v9 = vpop.f32.mrf.mxu1 }
 0xa01   :  { %950 = vst.msk [vmem:[#allocation2 + $0x8] sm:$0xff] %vm132_vm1, %v946_v9 }
 0xa0a   :  { %v1048_v10 = vpop.f32.mrf.mxu2 }
 0xa1a   :  { %v1265_v11 = vpop.f32.mrf.mxu2 }
 0xa1b   :  { %1273 = vrot.lane.b32.xlu2 %v1265_v11, %s1969_s30 }
 0xa23   :  { %v1155_v12 = vpop.f32.mrf.mxu1 }
 0xa24   :  { %1163 = vrot.lane.b32.xlu0 %v1155_v12, %s2529_s3 }
 0xa2b   :  { %v1158_v14 = vpop.f32.mrf.mxu1 }
 0xa2c   :  { %1055 = vrot.lane.b32.xlu0 %v1048_v10, %s1953_s22  ;;  %1165 = vrot.lane.b32.xlu1 %v1158_v14, %s2529_s3 }
 0xa3b   :  { %v1268_v15 = vpop.f32.mrf.mxu2 }
 0xa3c   :  { %1275 = vrot.lane.b32.xlu0 %v1268_v15, %s1969_s30 }
 0xa6b   :  { %v1054_v16 = vpop.permute.xlu0 %1053 }
 0xa6c   :  { %1059 = vst.msk [vmem:[#allocation2] sm:$0xff] %vm336_vm3, %v1054_v16 }
 0xa75   :  { %v1274_v21 = vpop.permute.xlu2 %1273 }
 0xa96   :  { %v1164_v20 = vpop.permute.xlu0 %1163 }
 0xa97   :  { %1169 = vst.msk [vmem:[#allocation2] sm:$0xff] %vm447_vm4, %v1164_v20  ;;  %v1687_v20 = vld [vmem:[%s2523_s7 + $0x78] sm:$0xff] }
 0xa98   :  { %1279 = vst.msk [vmem:[#allocation2] sm:$0xff] %vm558_vm5, %v1274_v21  ;;  %1455 = vmatpush.msrb.mxu3 %v1687_v20  ;;  %v1686_v21 = vld [vmem:[%s2523_s7 + $0x70] sm:$0xff]  ;;  %v1558_v20 = vld [vmem:[%s2525_s9 + $0x8] sm:$0xff] }
 0xa9a   :  { %1456 = vmatpush.msrb.mxu3 %v1686_v21 }
 0xa9e   :  { %v1056_v22 = vpop.permute.xlu0 %1055  ;;  %v1166_v23 = vpop.permute.xlu1 %1165 }
 0xa9f   :  { %1060 = vst.msk [vmem:[#allocation2 + $0x8] sm:$0xff] %vm336_vm3, %v1056_v22  ;;  %v1281_v24 = vld [vmem:[#allocation2] sm:$0xff]  ;;  %v1685_v22 = vld [vmem:[%s2523_s7 + $0x68] sm:$0xff] }
 0xaa0   :  { %1170 = vst.msk [vmem:[#allocation2 + $0x8] sm:$0xff] %vm447_vm4, %v1166_v23  ;;  %1672 = vmatmul.msk.f32.vlgmr.msrb.gmra.mxu0 %vm96_vm0, %v1281_v24  ;;  %1457 = vmatpush.msrb.mxu3 %v1685_v22  ;;  %v1684_v23 = vld [vmem:[%s2523_s7 + $0x60] sm:$0xff]  ;;  %v1683_v24 = vld [vmem:[%s2523_s7 + $0x58] sm:$0xff] }
 0xaa2   :  { %1458 = vmatpush.msrb.mxu3 %v1684_v23 }
 0xaa4   :  { %1459 = vmatpush.msrb.mxu3 %v1683_v24 }
 0xaae   :  { %v1276_v25 = vpop.permute.xlu0 %1275 }
 0xaaf   :  { %1280 = vst.msk [vmem:[#allocation2 + $0x8] sm:$0xff] %vm558_vm5, %v1276_v25  ;;  %v1682_v25 = vld [vmem:[%s2523_s7 + $0x50] sm:$0xff] }
 0xab0   :  { %1460 = vmatpush.msrb.mxu3 %v1682_v25 }
 0xab6   :  { %v1282_v27 = vld [vmem:[#allocation2 + $0x8] sm:$0xff] }
 0xab7   :  { %1673 = vmatmul.msk.f32.gmra.mxu0 %vm96_vm0, %v1282_v27  ;;  %v1681_v27 = vld [vmem:[%s2523_s7 + $0x48] sm:$0xff] }
 0xab8   :  { %1461 = vmatpush.msrb.mxu3 %v1681_v27 }
 0xb1d   :  { %v1312_v30 = vpop.f32.mrf.mxu0 }
 0xb1e   :  { %v1313_v31 = vadd.f32 %v1312_v30, %v1288_v29  ;;  %v1758_v30 = vld [vmem:[#allocation8 + $0x1] ss:$0 sm:$0xff] }
 0xb20   :  { %v1318_v32 = vadd.f32 %v1313_v31, %v2291_v45  ;;  %v1677_v45 = vld [vmem:[%s2521_s5 + $0x38] sm:$0xff] }
 0xb21   :  { %1402 = vmatpush.msrb.mxu1 %v1677_v45 }
 0xb22   :  { %v1320_v33 = vsel %vm96_vm0, %v1318_v32, 0.0  ;;  %v1328_v34 = vmul.f32 %v1318_v32, %v1318_v32 }
 0xb23   :  { %1321 = vadd.xlane.f32.xlu0 %v1320_v33  ;;  %1403 = vmatpush.msrb.mxu1 %v1676_v44 }
 0xb24   :  { %v1330_v36 = vsel %vm96_vm0, %v1328_v34, 0.0 }
 0xb25   :  { %1331 = vadd.xlane.f32.xlu2 %v1330_v36 }
 0xb34   :  { %v1315_v37 = vpop.f32.mrf.mxu0 }
 0xb35   :  { %v1316_v38 = vadd.f32 %v1315_v37, %v1288_v29  ;;  %v1680_v29 = vld [vmem:[%s2523_s7 + $0x40] sm:$0xff] }
 0xb36   :  { %1462 = vmatpush.msrb.mxu3 %v1680_v29 }
 0xb37   :  { %v1319_v39 = vadd.f32 %v1316_v38, %v2297_v61  ;;  %v1675_v61 = vld [vmem:[%s2521_s5 + $0x28] sm:$0xff] }
 0xb38   :  { %1404 = vmatpush.msrb.mxu1 %v1675_v61 }
 0xb39   :  { %v1323_v40 = vsel %vm96_vm0, %v1319_v39, 0.0  ;;  %v1329_v41 = vmul.f32 %v1319_v39, %v1319_v39 }
 0xb3a   :  { %1324 = vadd.xlane.f32.xlu1 %v1323_v40  ;;  %1405 = vmatpush.msrb.mxu1 %v1674_v46 }
 0xb3b   :  { %v1333_v43 = vsel %vm96_vm0, %v1329_v41, 0.0 }
 0xb3c   :  { %1334 = vadd.xlane.f32.xlu0 %v1333_v43 }
 0xb96   :  { %v1322_v47 = vpop.xlane.xlu0 %1321 }
 0xb97   :  { %v1326_v49 = vmul.f32 %v1322_v47, %v2226_v57 }
 0xb98   :  { %v1332_v4 = vpop.xlane.xlu2 %1331 }
 0xb99   :  { %v1338_v50 = vmul.f32 %v1326_v49, %v1326_v49  ;;  %v1336_v3 = vmul.f32 %v1332_v4, %v2226_v57  ;;  %v1342_v58 = vsub.f32 %v1318_v32, %v1326_v49 }
 0xb9b   :  { %v1340_v51 = vsub.f32 %v1336_v3, %v1338_v50 }
 0xb9d   :  { %v1344_v52 = vadd.f32 1e-05, %v1340_v51 }
 0xb9f   :  { %1837 = vrsqrt.f32 %v1344_v52  ;;  %vm1352_vm3 = vweird.f32 %v1344_v52 }
 0xba5   :  { %v1838_v53 = vpop.eup %1837 }
 0xba6   :  { %v1347_v48 = vmul.f32 %v1838_v53, %v1344_v52  ;;  %vm1353_vm1 = vweird.f32 %v1838_v53 }
 0xba7   :  { %vm1354_vm4 = vmor %vm1352_vm3, %vm1353_vm1 }
 0xba8   :  { %v1348_v54 = vmul.f32 %v1838_v53, %v1347_v48 }
 0xbaa   :  { %v1349_v35 = vmul.f32 0.5, %v1348_v54 }
 0xbac   :  { %v1350_v5 = vsub.f32 1.5, %v1349_v35 }
 0xbad   :  { %v1325_v55 = vpop.xlane.xlu1 %1324 }
 0xbae   :  { %v1351_v26 = vmul.f32 %v1838_v53, %v1350_v5  ;;  %v1327_v56 = vmul.f32 %v1325_v55, %v2226_v57 }
 0xbaf   :  { %v1335_v60 = vpop.xlane.xlu0 %1334 }
 0xbb0   :  { %v1355_v62 = vsel %vm1354_vm4, %v1838_v53, %v1351_v26  ;;  %v1339_v63 = vmul.f32 %v1327_v56, %v1327_v56  ;;  %v1337_v0 = vmul.f32 %v1335_v60, %v2226_v57  ;;  %v1343_v16 = vsub.f32 %v1319_v39, %v1327_v56 }
 0xbb1   :  { %v1366_v1 = vmul.f32 %v1355_v62, %v1342_v58  ;;  %v1440_v53 = vperm.slane %v2423_v28, 3 }
 0xbb2   :  { %v1341_v42 = vsub.f32 %v1337_v0, %v1339_v63 }
 0xbb3   :  { %v1369_v6 = vmul.f32 %v1368_v59, %v1366_v1 }
 0xbb4   :  { %v1345_v7 = vadd.f32 1e-05, %v1341_v42 }
 0xbb5   :  { %v2450_v8 = vadd.f32 %v1371_v2, %v1369_v6 }
 0xbb6   :  { %1839 = vrsqrt.f32 %v1345_v7  ;;  %vm1362_vm10 = vweird.f32 %v1345_v7 }
 0xbb7   :  { %1678 = vmatmul.msk.f32.vlgmr.msrb.gmra.mxu1 %vm96_vm0, %v2450_v8 }
 0xbbc   :  { %v1840_v9 = vpop.eup %1839 }
 0xbbd   :  { %v1357_v10 = vmul.f32 %v1840_v9, %v1345_v7  ;;  %vm1363_vm5 = vweird.f32 %v1840_v9 }
 0xbbe   :  { %vm1364_vm11 = vmor %vm1362_vm10, %vm1363_vm5 }
 0xbbf   :  { %v1358_v11 = vmul.f32 %v1840_v9, %v1357_v10 }
 0xbc1   :  { %v1359_v12 = vmul.f32 0.5, %v1358_v11 }
 0xbc3   :  { %v1360_v14 = vsub.f32 1.5, %v1359_v12 }
 0xbc5   :  { %v1361_v15 = vmul.f32 %v1840_v9, %v1360_v14 }
 0xbc7   :  { %v1365_v13 = vsel %vm1364_vm11, %v1840_v9, %v1361_v15 }
 0xbc8   :  { %v1367_v18 = vmul.f32 %v1365_v13, %v1343_v16  ;;  %v1560_v13 = vld [vmem:[%s2525_s9 + $0x18] sm:$0xff] }
 0xbc9   :  { %1576 = vmatpush.msra.mxu0 %v1560_v13 }
 0xbca   :  { %v1370_v19 = vmul.f32 %v1368_v59, %v1367_v18  ;;  %v1559_v18 = vld [vmem:[%s2525_s9 + $0x10] sm:$0xff] }
 0xbcb   :  { %1577 = vmatpush.msra.mxu0 %v1559_v18 }
 0xbcc   :  { %v1373_v17 = vadd.f32 %v1371_v2, %v1370_v19 }
 0xbcd   :  { %1578 = vmatpush.msra.mxu0 %v1558_v20 }
 0xbce   :  { %1679 = vmatmul.msk.f32.gmra.mxu1 %vm96_vm0, %v1373_v17 }
 0xc34   :  { %v1407_v31 = vpop.f32.mrf.mxu1 }
 0xc35   :  { %v1408_v32 = vadd.f32 %v1758_v30, %v1407_v31 }
 0xc37   :  { %v1413_v33 = vmul.f32 %v1408_v32, %v1408_v32 }
 0xc39   :  { %v1415_v34 = vmul.f32 %v1413_v33, %v1408_v32 }
 0xc3b   :  { %v1417_v36 = vmul.f32 0.044715, %v1415_v34 }
 0xc3d   :  { %v1419_v37 = vadd.f32 %v1417_v36, %v1408_v32 }
 0xc3f   :  { %v1421_v38 = vmul.f32 0.7978846, %v1419_v37 }
 0xc41   :  { %1841 = vtanh.f32 %v1421_v38 }
 0xc47   :  { %v1842_v39 = vpop.eup %1841 }
 0xc48   :  { %v1425_v40 = vadd.f32 1.0, %v1842_v39  ;;  %v1520_v39 = vperm.slane %v2423_v28, 4 }
 0xc4a   :  { %v1427_v41 = vmul.f32 0.5, %v1425_v40 }
 0xc4b   :  { %v1410_v43 = vpop.f32.mrf.mxu1 }
 0xc4c   :  { %v1429_v45 = vmul.f32 %v1427_v41, %v1408_v32  ;;  %v1411_v44 = vadd.f32 %v1758_v30, %v1410_v43  ;;  %v1526_v30 = vlaneseq }
 0xc4e   :  { %v1414_v61 = vmul.f32 %v1411_v44, %v1411_v44  ;;  %1688 = vmatmul.msk.f32.vlgmr.msrb.gmra.mxu3 %vm724_vm13, %v1429_v45  ;;  %v1527_v34 = vshrl.u32 %v1526_v30, 7  ;;  %v1529_v43 = vand.u32 127, %v1526_v30 }
 0xc50   :  { %v1416_v46 = vmul.f32 %v1414_v61, %v1411_v44  ;;  %v1530_v45 = vmul.u32 8, %v1527_v34 }
 0xc52   :  { %v1418_v47 = vmul.f32 0.044715, %v1416_v46  ;;  %v1523_v46 = vperm.slane %v2423_v28, 5  ;;  %vm1531_vm8 = vcmp.eq.s32.totalorder %v1529_v43, %v1530_v45 }
 0xc54   :  { %v1420_v49 = vadd.f32 %v1418_v47, %v1411_v44 }
 0xc56   :  { %v1422_v4 = vmul.f32 0.7978846, %v1420_v49 }
 0xc58   :  { %1843 = vtanh.f32 %v1422_v4 }
 0xc5e   :  { %v1844_v50 = vpop.eup %1843 }
 0xc5f   :  { %v1426_v3 = vadd.f32 1.0, %v1844_v50  ;;  %v1971_v50 = vmov 0.0  }
 0xc61   :  { %v1428_v51 = vmul.f32 0.5, %v1426_v3  ;;  %v1690_v3 = vsel %vm1531_vm8, 1.0, %v1971_v50 }
 0xc63   :  { %v1430_v52 = vmul.f32 %v1428_v51, %v1411_v44 }
 0xc65   :  { %1689 = vmatmul.msk.f32.gmra.mxu3 %vm724_vm13, %v1430_v52 }
 0xcd1   :  { %v1464_v48 = vpop.f32.mrf.mxu3 }
 0xcd2   :  { %v1465_v54 = vadd.f32 %v1464_v48, %v1440_v53 }
 0xcd4   :  { %v2483_v35 = vadd.f32 %v1465_v54, %v2450_v8 }
 0xcd6   :  { %v1472_v5 = vsel %vm96_vm0, %v2483_v35, 0.0  ;;  %v1480_v55 = vmul.f32 %v2483_v35, %v2483_v35 }
 0xcd7   :  { %1473 = vadd.xlane.f32.xlu0 %v1472_v5 }
 0xcd8   :  { %v1482_v26 = vsel %vm96_vm0, %v1480_v55, 0.0 }
 0xcd9   :  { %1483 = vadd.xlane.f32.xlu1 %v1482_v26 }
 0xce8   :  { %v1467_v56 = vpop.f32.mrf.mxu3 }
 0xce9   :  { %v1468_v58 = vadd.f32 %v1467_v56, %v1440_v53 }
 0xceb   :  { %v1471_v59 = vadd.f32 %v1468_v58, %v1373_v17 }
 0xced   :  { %v1475_v60 = vsel %vm96_vm0, %v1471_v59, 0.0  ;;  %v1481_v62 = vmul.f32 %v1471_v59, %v1471_v59 }
 0xcee   :  { %1476 = vadd.xlane.f32.xlu2 %v1475_v60 }
 0xcef   :  { %v1485_v63 = vsel %vm96_vm0, %v1481_v62, 0.0 }
 0xcf6   :  { %1486 = vadd.xlane.f32.xlu2 %v1485_v63 }
 0xd4a   :  { %v1474_v0 = vpop.xlane.xlu0 %1473 }
 0xd4b   :  { %v1478_v1 = vmul.f32 %v1474_v0, %v2226_v57 }
 0xd4c   :  { %v1484_v2 = vpop.xlane.xlu1 %1483 }
 0xd4d   :  { %v1490_v42 = vmul.f32 %v1478_v1, %v1478_v1  ;;  %v1488_v6 = vmul.f32 %v1484_v2, %v2226_v57  ;;  %v1494_v36 = vsub.f32 %v2483_v35, %v1478_v1 }
 0xd4f   :  { %v1492_v7 = vsub.f32 %v1488_v6, %v1490_v42 }
 0xd51   :  { %v1496_v8 = vadd.f32 1e-05, %v1492_v7 }
 0xd53   :  { %1845 = vrsqrt.f32 %v1496_v8  ;;  %vm1504_vm13 = vweird.f32 %v1496_v8 }
 0xd59   :  { %v1846_v10 = vpop.eup %1845 }
 0xd5a   :  { %v1499_v12 = vmul.f32 %v1846_v10, %v1496_v8  ;;  %vm1505_vm12 = vweird.f32 %v1846_v10 }
 0xd5b   :  { %vm1506_vm14 = vmor %vm1504_vm13, %vm1505_vm12 }
 0xd5c   :  { %v1500_v17 = vmul.f32 %v1846_v10, %v1499_v12 }
 0xd5e   :  { %v1501_v22 = vmul.f32 0.5, %v1500_v17 }
 0xd60   :  { %v1502_v23 = vsub.f32 1.5, %v1501_v22 }
 0xd61   :  { %v1477_v9 = vpop.xlane.xlu2 %1476 }
 0xd62   :  { %v1479_v11 = vmul.f32 %v1477_v9, %v2226_v57  ;;  %v1503_v27 = vmul.f32 %v1846_v10, %v1502_v23 }
 0xd64   :  { %v1491_v15 = vmul.f32 %v1479_v11, %v1479_v11  ;;  %v1507_v33 = vsel %vm1506_vm14, %v1846_v10, %v1503_v27  ;;  %v1495_v38 = vsub.f32 %v1471_v59, %v1479_v11 }
 0xd65   :  { %v1518_v40 = vmul.f32 %v1507_v33, %v1494_v36 }
 0xd67   :  { %v1521_v47 = vmul.f32 %v1520_v39, %v1518_v40 }
 0xd69   :  { %v1487_v14 = vpop.xlane.xlu2 %1486  ;;  %v1524_v4 = vadd.f32 %v1523_v46, %v1521_v47 }
 0xd6a   :  { %v1489_v16 = vmul.f32 %v1487_v14, %v2226_v57  ;;  %v1557_v57 = vld [vmem:[%s2525_s9] sm:$0xff]  ;;  %s1972_s9 = smov [#allocation9]  }
 0xd6b   :  { %1579 = vmatpush.msra.mxu0 %v1557_v57  ;;  %s1591_s0 = sshll.u32 %s1972_s9, 4  ;;  %s1592_s0 = int_to_ptr.vmem [resolvable:$true] %s1591_s0 }
 0xd6c   :  { %v1493_v19 = vsub.f32 %v1489_v16, %v1491_v15 }
 0xd6e   :  { %v1497_v21 = vadd.f32 1e-05, %v1493_v19 }
 0xd70   :  { %1847 = vrsqrt.f32 %v1497_v21  ;;  %vm1514_vm6 = vweird.f32 %v1497_v21 }
 0xd76   :  { %v1848_v24 = vpop.eup %1847 }
 0xd77   :  { %v1509_v25 = vmul.f32 %v1848_v24, %v1497_v21  ;;  %vm1515_vm15 = vweird.f32 %v1848_v24 }
 0xd78   :  { %vm1516_vm7 = vmor %vm1514_vm6, %vm1515_vm15 }
 0xd79   :  { %v1510_v29 = vmul.f32 %v1848_v24, %v1509_v25 }
 0xd7b   :  { %v1511_v31 = vmul.f32 0.5, %v1510_v29 }
 0xd7d   :  { %v1512_v32 = vsub.f32 1.5, %v1511_v31 }
 0xd7f   :  { %v1513_v37 = vmul.f32 %v1848_v24, %v1512_v32 }
 0xd81   :  { %v1517_v41 = vsel %vm1516_vm7, %v1848_v24, %v1513_v37 }
 0xd82   :  { %v1519_v44 = vmul.f32 %v1517_v41, %v1495_v38 }
 0xd84   :  { %v1522_v61 = vmul.f32 %v1520_v39, %v1519_v44 }
 0xd86   :  { %v1525_v49 = vadd.f32 %v1523_v46, %v1522_v61 }
 0xd88   :  { %1551 = vmatpush.msra.mxu2 %v1525_v49 }
 0xd8a   :  { %1552 = vmatpush.msra.mxu2 %v1524_v4 }
 0xd8b   :  { %1691 = vmatmul.msk.f32.vlgmr.msra.gmra.mxu2 %vm168_vm2, %v1690_v3 }
 0xe0e   :  { %v1554_v51 = vpop.f32.mrf.mxu2 }
 0xe0f   :  { %1692 = vmatmul.msk.f32.vlgmr.msra.gmra.mxu0 %vm96_vm0, %v1554_v51 }
 0xe8c   :  { %v1581_v28 = vpop.f32.mrf.mxu0 }
 0xe8d   :  { %1585 = vst.msk [vmem:[#allocation9] sm:$0x3] %vm1584_vm9, %v1581_v28 }
 0xe8e   :  { %1596 = dma.vmem_to_hbm [thread:$0]  %s1592_s0, 32, %s1594_s29, [#allocation5]  }
 0xe8f   :  { %1949 = dma.done.wait [#allocation5], 32  }
 0xe90   :  { %1950 = vsyncadd [#allocation5], 4294967264 }
 0xe91   :  { %1601 = vsyncpa [#allocation4], 1 }
 0xe92   :  { %1602 = vsyncpa [#allocation7], 1 }
 0xe93   :  { %1603 = vsyncpa [#allocation5], 1 }

</bundles_post_ra>
